<compile_context>
chip_gen: v5e
topology: v5e:2x2
jax: 0.10.0
libtpu: 0.0.40
codegen_flags: <defaults>
</compile_context>

<pallas_src>
import jax
import jax.numpy as jnp
from jax.experimental import pallas as pl
from jax.experimental.pallas import tpu as pltpu

# -------------------- model hyper-parameters (small, synthetic) -------------
INPUT_DIM = 50        # vocab size
EMB_DIM = 16
ENC_HID_DIM = 32
OUTPUT_DIM = 10
DROPOUT = 0.25        # TODO(synk): dropout treated as identity (eval / inference mode)
T, B = 8, 4           # seq_len, batch
H = ENC_HID_DIM
BP = 8                # batch padded to one full sublane tile
TBP = T * BP          # 64
H2, H4, H6 = 2 * H, 4 * H, 6 * H          # 64, 128, 192
VOCAB_PAD = 56        # 50 -> next multiple of 8

# Packed-slab row offsets (all multiples of 8 => every in-kernel slice is
# sublane-aligned).  Slab width = 6H = 192 lanes.
R_E0 = 0                       # 56 rows: embedding @ merged layer-0 W_ih
R_BI0 = R_E0 + VOCAB_PAD       # 56   : merged b_ih0 (1 real row)
R_WHH0 = R_BI0 + 8             # 64   : block-diag W_hh0 (64 rows)
R_BH0 = R_WHH0 + H2            # 128  : merged b_hh0
R_WI1 = R_BH0 + 8              # 136  : merged W_ih1 (64 rows)
R_BI1 = R_WI1 + H2             # 200
R_WHH1 = R_BI1 + 8             # 208  : block-diag W_hh1
R_BH1 = R_WHH1 + H2            # 272
R_WLIN = R_BH1 + 8             # 280  : W_lin^T, cols 0:OUTPUT_DIM real
R_BLIN = R_WLIN + H2           # 344  : b_lin,   cols 0:OUTPUT_DIM real
SLAB_ROWS = R_BLIN + 8         # 352


# ============================ fused Pallas kernel ============================

def encoder_kernel(tok_ref, slab_ref, out_ref, out0_ref):
    """Whole encoder in one grid point: fused embedding + 2-layer biGRU + Linear."""
    f32 = jnp.float32

    # Lane mask for the gate-major layout [r_f r_b | z_f z_b | n_f n_b]:
    # within each 2H-wide gate pair the first H lanes belong to the forward
    # direction, the next H to the backward direction.
    lane = jax.lax.broadcasted_iota(jnp.int32, (BP, H6), 1)
    fwd_mask = (lane & (H2 - 1)) < H

    def fused_bidir(gi_all, w_hh, b_hh, store_out):
        """One serial recurrence carrying both directions: h = [h_f | h_b]."""
        h = jnp.zeros((BP, H2), f32)
        for s in range(T):                                   # static, unrolled
            # Forward gates need time s, backward gates need time T-1-s.
            gi = jnp.where(fwd_mask,
                           gi_all[s * BP:(s + 1) * BP, :],
                           gi_all[(T - 1 - s) * BP:(T - s) * BP, :])
            gh = jnp.dot(h, w_hh, preferred_element_type=f32) + b_hh
            rz = jax.nn.sigmoid(gi[:, 0:H4] + gh[:, 0:H4])   # [r_f r_b z_f z_b]
            r, z = rz[:, 0:H2], rz[:, H2:H4]
            n = jnp.tanh(gi[:, H4:H6] + r * gh[:, H4:H6])    # [n_f n_b]
            h = (1.0 - z) * n + z * h
            if store_out:
                # fwd output belongs to time s, bwd output to time T-1-s.
                out0_ref[s * BP:(s + 1) * BP, 0:H] = h[:, 0:H]
                out0_ref[(T - 1 - s) * BP:(T - s) * BP, H:H2] = h[:, H:H2]
        return h

    # ---- layer 0: embedding gather fused into the hoisted input projection --
    tok = tok_ref[...]                                               # (TBP, 1) int32
    vocab = jax.lax.broadcasted_iota(jnp.int32, (TBP, VOCAB_PAD), 1)
    onehot = (vocab == tok).astype(f32)                              # exact row gather
    gi0 = (jnp.dot(onehot, slab_ref[R_E0:R_E0 + VOCAB_PAD, :],
                   preferred_element_type=f32)
           + slab_ref[R_BI0:R_BI0 + 1, :])                           # (TBP, 6H)
    fused_bidir(gi0,
                slab_ref[R_WHH0:R_WHH0 + H2, :],
                slab_ref[R_BH0:R_BH0 + 1, :],
                store_out=True)

    # ---- layer 1 (only its final hidden states are needed by the module) ----
    gi1 = (jnp.dot(out0_ref[...], slab_ref[R_WI1:R_WI1 + H2, :],
                   preferred_element_type=f32)
           + slab_ref[R_BI1:R_BI1 + 1, :])                           # (TBP, 6H)
    hT = fused_bidir(gi1,
                     slab_ref[R_WHH1:R_WHH1 + H2, :],
                     slab_ref[R_BH1:R_BH1 + 1, :],
                     store_out=False)                                # (BP, 2H) = [h_f|h_b]

    # ---- final Linear on cat(hidden[-2], hidden[-1]) = [h_f | h_b] ----------
    pred = (jnp.dot(hT, slab_ref[R_WLIN:R_WLIN + H2, :],
                    preferred_element_type=f32)
            + slab_ref[R_BLIN:R_BLIN + 1, :])                        # (BP, 192)
    out_ref[...] = pred[0:B, 0:OUTPUT_DIM]                           # drop batch padding


# ============================ parameter packing ==============================

def pack_params(params):
    """One-time packing of all weights into a single (SLAB_ROWS, 6H) f32 slab."""

    def merged_ih(wf, bf, wb, bb):
        # torch weights (3H, D_in); -> (D_in, 6H), (1, 6H) in gate-major
        # column order [r_f r_b | z_f z_b | n_f n_b].
        wtf, wtb = wf.T, wb.T
        wcols, bcols = [], []
        for g in range(3):
            wcols += [wtf[:, g * H:(g + 1) * H], wtb[:, g * H:(g + 1) * H]]
            bcols += [bf[g * H:(g + 1) * H], bb[g * H:(g + 1) * H]]
        return jnp.concatenate(wcols, axis=1), jnp.concatenate(bcols).reshape(1, H6)

    def blockdiag_hh(wf, bf, wb, bb):
        # (2H, 6H) block-diagonal hidden->gates matrix for the fused recurrence
        # (rows 0:H act on h_f, rows H:2H on h_b), same gate-major columns.
        wtf, wtb = wf.T, wb.T                                  # (H, 3H)
        w = jnp.zeros((H2, H6), jnp.float32)
        bcols = []
        for g in range(3):
            w = w.at[0:H, (2 * g) * H:(2 * g + 1) * H].set(wtf[:, g * H:(g + 1) * H])
            w = w.at[H:H2, (2 * g + 1) * H:(2 * g + 2) * H].set(wtb[:, g * H:(g + 1) * H])
            bcols += [bf[g * H:(g + 1) * H], bb[g * H:(g + 1) * H]]
        return w, jnp.concatenate(bcols).reshape(1, H6)

    w0f_ih, w0f_hh, b0f_ih, b0f_hh = params["l0_fwd"]
    w0b_ih, w0b_hh, b0b_ih, b0b_hh = params["l0_bwd"]
    w1f_ih, w1f_hh, b1f_ih, b1f_hh = params["l1_fwd"]
    w1b_ih, w1b_hh, b1b_ih, b1b_hh = params["l1_bwd"]

    wi0, bi0 = merged_ih(w0f_ih, b0f_ih, w0b_ih, b0b_ih)       # (EMB_DIM, 6H)
    wh0, bh0 = blockdiag_hh(w0f_hh, b0f_hh, w0b_hh, b0b_hh)
    wi1, bi1 = merged_ih(w1f_ih, b1f_ih, w1b_ih, b1b_ih)       # (2H, 6H)
    wh1, bh1 = blockdiag_hh(w1f_hh, b1f_hh, w1b_hh, b1b_hh)

    # Fold the embedding table into the layer-0 input projection: row v of E0
    # is exactly embedding[v] @ W_ih0_merged, so the in-kernel one-hot matmul
    # performs the nn.Embedding gather and the hoisted projection together.
    e0 = params["embedding"] @ wi0                             # (INPUT_DIM, 6H)

    slab = jnp.zeros((SLAB_ROWS, H6), jnp.float32)
    slab = slab.at[R_E0:R_E0 + INPUT_DIM, :].set(e0)
    slab = slab.at[R_BI0:R_BI0 + 1, :].set(bi0)
    slab = slab.at[R_WHH0:R_WHH0 + H2, :].set(wh0)
    slab = slab.at[R_BH0:R_BH0 + 1, :].set(bh0)
    slab = slab.at[R_WI1:R_WI1 + H2, :].set(wi1)
    slab = slab.at[R_BI1:R_BI1 + 1, :].set(bi1)
    slab = slab.at[R_WHH1:R_WHH1 + H2, :].set(wh1)
    slab = slab.at[R_BH1:R_BH1 + 1, :].set(bh1)
    slab = slab.at[R_WLIN:R_WLIN + H2, 0:OUTPUT_DIM].set(params["lin_w"].T)
    slab = slab.at[R_BLIN, 0:OUTPUT_DIM].set(params["lin_b"])
    return slab


# ============================ wrapper ========================================

@jax.jit
def encoder_forward(tokens, slab):
    """tokens: (T, B) int32, slab: packed params -> predictions (B, OUTPUT_DIM)."""
    # Pad batch 4 -> 8 (token 0, harmless: padded rows never touch real rows).
    tok_p = jnp.zeros((T, BP), jnp.int32).at[:, :B].set(tokens)
    tok_flat = tok_p.reshape(TBP, 1)
    return pl.pallas_call(
        encoder_kernel,
        out_shape=jax.ShapeDtypeStruct((B, OUTPUT_DIM), jnp.float32),
        in_specs=[pl.BlockSpec((TBP, 1), lambda: (0, 0)),
                  pl.BlockSpec((SLAB_ROWS, H6), lambda: (0, 0))],
        out_specs=pl.BlockSpec((B, OUTPUT_DIM), lambda: (0, 0)),
        scratch_shapes=[pltpu.VMEM((TBP, H2), jnp.float32)],   # layer-0 outputs
    )(tok_flat, slab)


# ============================ pure-JAX reference ============================

def _gru_cell_ref(x_t, h_prev, w_ih, w_hh, b_ih, b_hh):
    Hh = h_prev.shape[-1]
    gi = x_t @ w_ih.T + b_ih
    gh = h_prev @ w_hh.T + b_hh
    r = jax.nn.sigmoid(gi[:, :Hh] + gh[:, :Hh])
    z = jax.nn.sigmoid(gi[:, Hh:2 * Hh] + gh[:, Hh:2 * Hh])
    n = jnp.tanh(gi[:, 2 * Hh:] + r * gh[:, 2 * Hh:])
    return (1.0 - z) * n + z * h_prev


def _gru_direction_ref(x, w_ih, w_hh, b_ih, b_hh, reverse):
    if reverse:
        x = jnp.flip(x, axis=0)
    Hh = w_hh.shape[1]
    h0 = jnp.zeros((x.shape[1], Hh), jnp.float32)

    def step(h, x_t):
        h_new = _gru_cell_ref(x_t, h, w_ih, w_hh, b_ih, b_hh)
        return h_new, h_new

    h_final, outs = jax.lax.scan(step, h0, x)
    if reverse:
        outs = jnp.flip(outs, axis=0)
    return outs, h_final


def encoder_forward_ref(tokens, params):
    x = params["embedding"][tokens]
    h_f = h_b = None
    for layer in range(2):
        out_f, h_f = _gru_direction_ref(x, *params[f"l{layer}_fwd"], False)
        out_b, h_b = _gru_direction_ref(x, *params[f"l{layer}_bwd"], True)
        x = jnp.concatenate([out_f, out_b], axis=-1)
    hidden = jnp.concatenate([h_f, h_b], axis=1)
    return hidden @ params["lin_w"].T + params["lin_b"]


# ============================ parameter init ================================

def init_params(key):
    keys = jax.random.split(key, 32)
    ki = iter(keys)

    def u(shape, scale):
        return jax.random.uniform(next(ki), shape, jnp.float32, -scale, scale)

    params = {
        "embedding": jax.random.normal(next(ki), (INPUT_DIM, EMB_DIM), jnp.float32),
        "lin_w": u((OUTPUT_DIM, 2 * H), 1.0 / jnp.sqrt(2.0 * H)),
        "lin_b": u((OUTPUT_DIM,), 1.0 / jnp.sqrt(2.0 * H)),
    }
    s = 1.0 / float(jnp.sqrt(jnp.float32(H)))
    for layer in range(2):
        d_in = EMB_DIM if layer == 0 else 2 * H
        for direction in ("fwd", "bwd"):
            params[f"l{layer}_{direction}"] = (
                u((3 * H, d_in), s),   # w_ih
                u((3 * H, H), s),      # w_hh
                u((3 * H,), s),        # b_ih
                u((3 * H,), s),        # b_hh
            )
    return params


# ============================ main ==========================================

if __name__ == "__main__":
    key = jax.random.PRNGKey(0)
    pkey, tkey = jax.random.split(key)
    params = init_params(pkey)
    slab = jax.block_until_ready(pack_params(params))        # one-time packing

    tokens = jax.random.randint(tkey, (T, B), 0, INPUT_DIM, dtype=jnp.int32)

    preds = jax.block_until_ready(encoder_forward(tokens, slab))
    ref = jax.block_until_ready(encoder_forward_ref(tokens, params))

    assert preds.shape == (B, OUTPUT_DIM)
    assert jnp.allclose(preds, ref, atol=1e-4, rtol=1e-4), (
        f"mismatch: max abs err {float(jnp.max(jnp.abs(preds - ref)))}")

    print("KERNEL_OK")
</pallas_src>

<mosaic_0001>
module attributes {stable_mosaic.version = 11 : i64} {
  func.func @encoder_kernel(%arg0: memref<64x1xi32, #tpu.memory_space<vmem>>, %arg1: memref<352x192xf32, #tpu.memory_space<vmem>>, %arg2: memref<4x10xf32, #tpu.memory_space<vmem>>, %arg3: memref<64x64xf32, #tpu.memory_space<vmem>>) attributes {dimension_semantics = [], scalar_prefetch = 0 : i64, scratch_operands = 1 : i64, tpu.core_type = #tpu.core_type<tc>} {
    %0 = tpu.iota {dimensions = array<i32: 1>} : vector<8x192xi32>
    %c63_i32 = arith.constant 63 : i32
    %1 = vector.broadcast %c63_i32 : i32 to vector<8x192xi32>
    %2 = arith.andi %0, %1 : vector<8x192xi32>
    %c32_i32 = arith.constant 32 : i32
    %3 = vector.broadcast %c32_i32 : i32 to vector<8x192xi32>
    %4 = arith.cmpi slt, %2, %3 : vector<8x192xi32>
    %c0 = arith.constant 0 : index
    %c0_0 = arith.constant 0 : index
    %5 = vector.load %arg0[%c0, %c0_0] : memref<64x1xi32, #tpu.memory_space<vmem>>, vector<64x1xi32>
    %6 = tpu.iota {dimensions = array<i32: 1>} : vector<64x56xi32>
    %7 = vector.broadcast %5 : vector<64x1xi32> to vector<64x56xi32>
    %8 = arith.cmpi eq, %6, %7 : vector<64x56xi32>
    %9 = arith.extui %8 : vector<64x56xi1> to vector<64x56xi32>
    %10 = arith.sitofp %9 : vector<64x56xi32> to vector<64x56xf32>
    %c0_1 = arith.constant 0 : index
    %c0_2 = arith.constant 0 : index
    %11 = vector.load %arg1[%c0_1, %c0_2] : memref<352x192xf32, #tpu.memory_space<vmem>>, vector<56x192xf32>
    %cst = arith.constant dense<0.000000e+00> : vector<64x192xf32>
    %12 = tpu.matmul %10, %11, %cst {dimension_numbers = #tpu.dot_dimension_numbers<[1], [0], [0], [1], [0, 0, 1, 1], [], []>} : vector<64x56xf32>, vector<56x192xf32>, vector<64x192xf32> -> vector<64x192xf32>
    %c56 = arith.constant 56 : index
    %c0_3 = arith.constant 0 : index
    %13 = vector.load %arg1[%c56, %c0_3] : memref<352x192xf32, #tpu.memory_space<vmem>>, vector<1x192xf32>
    %14 = vector.broadcast %13 : vector<1x192xf32> to vector<64x192xf32>
    %15 = arith.addf %12, %14 : vector<64x192xf32>
    %c64 = arith.constant 64 : index
    %c0_4 = arith.constant 0 : index
    %16 = vector.load %arg1[%c64, %c0_4] : memref<352x192xf32, #tpu.memory_space<vmem>>, vector<64x192xf32>
    %c128 = arith.constant 128 : index
    %c0_5 = arith.constant 0 : index
    %17 = vector.load %arg1[%c128, %c0_5] : memref<352x192xf32, #tpu.memory_space<vmem>>, vector<1x192xf32>
    %cst_6 = arith.constant 0.000000e+00 : f32
    %18 = vector.broadcast %cst_6 : f32 to vector<8x64xf32>
    %19 = vector.extract_strided_slice %15 {offsets = [0, 0], sizes = [8, 192], strides = [1, 1]} : vector<64x192xf32> to vector<8x192xf32>
    %20 = vector.extract_strided_slice %15 {offsets = [56, 0], sizes = [8, 192], strides = [1, 1]} : vector<64x192xf32> to vector<8x192xf32>
    %21 = arith.select %4, %19, %20 : vector<8x192xi1>, vector<8x192xf32>
    %cst_7 = arith.constant dense<0.000000e+00> : vector<8x192xf32>
    %22 = tpu.matmul %18, %16, %cst_7 {dimension_numbers = #tpu.dot_dimension_numbers<[1], [0], [0], [1], [0, 0, 1, 1], [], []>} : vector<8x64xf32>, vector<64x192xf32>, vector<8x192xf32> -> vector<8x192xf32>
    %23 = vector.broadcast %17 : vector<1x192xf32> to vector<8x192xf32>
    %24 = arith.addf %22, %23 : vector<8x192xf32>
    %25 = vector.extract_strided_slice %21 {offsets = [0, 0], sizes = [8, 128], strides = [1, 1]} : vector<8x192xf32> to vector<8x128xf32>
    %26 = vector.extract_strided_slice %24 {offsets = [0, 0], sizes = [8, 128], strides = [1, 1]} : vector<8x192xf32> to vector<8x128xf32>
    %27 = arith.addf %25, %26 : vector<8x128xf32>
    %28 = arith.negf %27 : vector<8x128xf32>
    %29 = math.exp %28 : vector<8x128xf32>
    %cst_8 = arith.constant 1.000000e+00 : f32
    %30 = vector.broadcast %cst_8 : f32 to vector<8x128xf32>
    %31 = arith.addf %30, %29 : vector<8x128xf32>
    %32 = arith.divf %30, %31 : vector<8x128xf32>
    %33 = vector.extract_strided_slice %32 {offsets = [0, 0], sizes = [8, 64], strides = [1, 1]} : vector<8x128xf32> to vector<8x64xf32>
    %34 = vector.extract_strided_slice %32 {offsets = [0, 64], sizes = [8, 64], strides = [1, 1]} : vector<8x128xf32> to vector<8x64xf32>
    %35 = vector.extract_strided_slice %21 {offsets = [0, 128], sizes = [8, 64], strides = [1, 1]} : vector<8x192xf32> to vector<8x64xf32>
    %36 = vector.extract_strided_slice %24 {offsets = [0, 128], sizes = [8, 64], strides = [1, 1]} : vector<8x192xf32> to vector<8x64xf32>
    %37 = arith.mulf %33, %36 : vector<8x64xf32>
    %38 = arith.addf %35, %37 : vector<8x64xf32>
    %39 = math.tanh %38 : vector<8x64xf32>
    %cst_9 = arith.constant 1.000000e+00 : f32
    %40 = vector.broadcast %cst_9 : f32 to vector<8x64xf32>
    %41 = arith.subf %40, %34 : vector<8x64xf32>
    %42 = arith.mulf %41, %39 : vector<8x64xf32>
    %43 = arith.mulf %34, %18 : vector<8x64xf32>
    %44 = arith.addf %42, %43 : vector<8x64xf32>
    %45 = vector.extract_strided_slice %44 {offsets = [0, 0], sizes = [8, 32], strides = [1, 1]} : vector<8x64xf32> to vector<8x32xf32>
    %c0_10 = arith.constant 0 : index
    %c0_11 = arith.constant 0 : index
    %46 = vector.load %arg3[%c0_10, %c0_11] : memref<64x64xf32, #tpu.memory_space<vmem>>, vector<8x32xf32>
    tpu.vector_store %arg3[%c0_10, %c0_11], %45 {strides = array<i32>} : memref<64x64xf32, #tpu.memory_space<vmem>>, vector<8x32xf32>,
    %47 = vector.extract_strided_slice %44 {offsets = [0, 32], sizes = [8, 32], strides = [1, 1]} : vector<8x64xf32> to vector<8x32xf32>
    %c56_12 = arith.constant 56 : index
    %c32 = arith.constant 32 : index
    %48 = vector.load %arg3[%c56_12, %c32] : memref<64x64xf32, #tpu.memory_space<vmem>>, vector<8x32xf32>
    tpu.vector_store %arg3[%c56_12, %c32], %47 {strides = array<i32>} : memref<64x64xf32, #tpu.memory_space<vmem>>, vector<8x32xf32>,
    %49 = vector.extract_strided_slice %15 {offsets = [8, 0], sizes = [8, 192], strides = [1, 1]} : vector<64x192xf32> to vector<8x192xf32>
    %50 = vector.extract_strided_slice %15 {offsets = [48, 0], sizes = [8, 192], strides = [1, 1]} : vector<64x192xf32> to vector<8x192xf32>
    %51 = arith.select %4, %49, %50 : vector<8x192xi1>, vector<8x192xf32>
    %cst_13 = arith.constant dense<0.000000e+00> : vector<8x192xf32>
    %52 = tpu.matmul %44, %16, %cst_13 {dimension_numbers = #tpu.dot_dimension_numbers<[1], [0], [0], [1], [0, 0, 1, 1], [], []>} : vector<8x64xf32>, vector<64x192xf32>, vector<8x192xf32> -> vector<8x192xf32>
    %53 = vector.broadcast %17 : vector<1x192xf32> to vector<8x192xf32>
    %54 = arith.addf %52, %53 : vector<8x192xf32>
    %55 = vector.extract_strided_slice %51 {offsets = [0, 0], sizes = [8, 128], strides = [1, 1]} : vector<8x192xf32> to vector<8x128xf32>
    %56 = vector.extract_strided_slice %54 {offsets = [0, 0], sizes = [8, 128], strides = [1, 1]} : vector<8x192xf32> to vector<8x128xf32>
    %57 = arith.addf %55, %56 : vector<8x128xf32>
    %58 = arith.negf %57 : vector<8x128xf32>
    %59 = math.exp %58 : vector<8x128xf32>
    %cst_14 = arith.constant 1.000000e+00 : f32
    %60 = vector.broadcast %cst_14 : f32 to vector<8x128xf32>
    %61 = arith.addf %60, %59 : vector<8x128xf32>
    %62 = arith.divf %60, %61 : vector<8x128xf32>
    %63 = vector.extract_strided_slice %62 {offsets = [0, 0], sizes = [8, 64], strides = [1, 1]} : vector<8x128xf32> to vector<8x64xf32>
    %64 = vector.extract_strided_slice %62 {offsets = [0, 64], sizes = [8, 64], strides = [1, 1]} : vector<8x128xf32> to vector<8x64xf32>
    %65 = vector.extract_strided_slice %51 {offsets = [0, 128], sizes = [8, 64], strides = [1, 1]} : vector<8x192xf32> to vector<8x64xf32>
    %66 = vector.extract_strided_slice %54 {offsets = [0, 128], sizes = [8, 64], strides = [1, 1]} : vector<8x192xf32> to vector<8x64xf32>
    %67 = arith.mulf %63, %66 : vector<8x64xf32>
    %68 = arith.addf %65, %67 : vector<8x64xf32>
    %69 = math.tanh %68 : vector<8x64xf32>
    %cst_15 = arith.constant 1.000000e+00 : f32
    %70 = vector.broadcast %cst_15 : f32 to vector<8x64xf32>
    %71 = arith.subf %70, %64 : vector<8x64xf32>
    %72 = arith.mulf %71, %69 : vector<8x64xf32>
    %73 = arith.mulf %64, %44 : vector<8x64xf32>
    %74 = arith.addf %72, %73 : vector<8x64xf32>
    %75 = vector.extract_strided_slice %74 {offsets = [0, 0], sizes = [8, 32], strides = [1, 1]} : vector<8x64xf32> to vector<8x32xf32>
    %c8 = arith.constant 8 : index
    %c0_16 = arith.constant 0 : index
    %76 = vector.load %arg3[%c8, %c0_16] : memref<64x64xf32, #tpu.memory_space<vmem>>, vector<8x32xf32>
    tpu.vector_store %arg3[%c8, %c0_16], %75 {strides = array<i32>} : memref<64x64xf32, #tpu.memory_space<vmem>>, vector<8x32xf32>,
    %77 = vector.extract_strided_slice %74 {offsets = [0, 32], sizes = [8, 32], strides = [1, 1]} : vector<8x64xf32> to vector<8x32xf32>
    %c48 = arith.constant 48 : index
    %c32_17 = arith.constant 32 : index
    %78 = vector.load %arg3[%c48, %c32_17] : memref<64x64xf32, #tpu.memory_space<vmem>>, vector<8x32xf32>
    tpu.vector_store %arg3[%c48, %c32_17], %77 {strides = array<i32>} : memref<64x64xf32, #tpu.memory_space<vmem>>, vector<8x32xf32>,
    %79 = vector.extract_strided_slice %15 {offsets = [16, 0], sizes = [8, 192], strides = [1, 1]} : vector<64x192xf32> to vector<8x192xf32>
    %80 = vector.extract_strided_slice %15 {offsets = [40, 0], sizes = [8, 192], strides = [1, 1]} : vector<64x192xf32> to vector<8x192xf32>
    %81 = arith.select %4, %79, %80 : vector<8x192xi1>, vector<8x192xf32>
    %cst_18 = arith.constant dense<0.000000e+00> : vector<8x192xf32>
    %82 = tpu.matmul %74, %16, %cst_18 {dimension_numbers = #tpu.dot_dimension_numbers<[1], [0], [0], [1], [0, 0, 1, 1], [], []>} : vector<8x64xf32>, vector<64x192xf32>, vector<8x192xf32> -> vector<8x192xf32>
    %83 = vector.broadcast %17 : vector<1x192xf32> to vector<8x192xf32>
    %84 = arith.addf %82, %83 : vector<8x192xf32>
    %85 = vector.extract_strided_slice %81 {offsets = [0, 0], sizes = [8, 128], strides = [1, 1]} : vector<8x192xf32> to vector<8x128xf32>
    %86 = vector.extract_strided_slice %84 {offsets = [0, 0], sizes = [8, 128], strides = [1, 1]} : vector<8x192xf32> to vector<8x128xf32>
    %87 = arith.addf %85, %86 : vector<8x128xf32>
    %88 = arith.negf %87 : vector<8x128xf32>
    %89 = math.exp %88 : vector<8x128xf32>
    %cst_19 = arith.constant 1.000000e+00 : f32
    %90 = vector.broadcast %cst_19 : f32 to vector<8x128xf32>
    %91 = arith.addf %90, %89 : vector<8x128xf32>
    %92 = arith.divf %90, %91 : vector<8x128xf32>
    %93 = vector.extract_strided_slice %92 {offsets = [0, 0], sizes = [8, 64], strides = [1, 1]} : vector<8x128xf32> to vector<8x64xf32>
    %94 = vector.extract_strided_slice %92 {offsets = [0, 64], sizes = [8, 64], strides = [1, 1]} : vector<8x128xf32> to vector<8x64xf32>
    %95 = vector.extract_strided_slice %81 {offsets = [0, 128], sizes = [8, 64], strides = [1, 1]} : vector<8x192xf32> to vector<8x64xf32>
    %96 = vector.extract_strided_slice %84 {offsets = [0, 128], sizes = [8, 64], strides = [1, 1]} : vector<8x192xf32> to vector<8x64xf32>
    %97 = arith.mulf %93, %96 : vector<8x64xf32>
    %98 = arith.addf %95, %97 : vector<8x64xf32>
    %99 = math.tanh %98 : vector<8x64xf32>
    %cst_20 = arith.constant 1.000000e+00 : f32
    %100 = vector.broadcast %cst_20 : f32 to vector<8x64xf32>
    %101 = arith.subf %100, %94 : vector<8x64xf32>
    %102 = arith.mulf %101, %99 : vector<8x64xf32>
    %103 = arith.mulf %94, %74 : vector<8x64xf32>
    %104 = arith.addf %102, %103 : vector<8x64xf32>
    %105 = vector.extract_strided_slice %104 {offsets = [0, 0], sizes = [8, 32], strides = [1, 1]} : vector<8x64xf32> to vector<8x32xf32>
    %c16 = arith.constant 16 : index
    %c0_21 = arith.constant 0 : index
    %106 = vector.load %arg3[%c16, %c0_21] : memref<64x64xf32, #tpu.memory_space<vmem>>, vector<8x32xf32>
    tpu.vector_store %arg3[%c16, %c0_21], %105 {strides = array<i32>} : memref<64x64xf32, #tpu.memory_space<vmem>>, vector<8x32xf32>,
    %107 = vector.extract_strided_slice %104 {offsets = [0, 32], sizes = [8, 32], strides = [1, 1]} : vector<8x64xf32> to vector<8x32xf32>
    %c40 = arith.constant 40 : index
    %c32_22 = arith.constant 32 : index
    %108 = vector.load %arg3[%c40, %c32_22] : memref<64x64xf32, #tpu.memory_space<vmem>>, vector<8x32xf32>
    tpu.vector_store %arg3[%c40, %c32_22], %107 {strides = array<i32>} : memref<64x64xf32, #tpu.memory_space<vmem>>, vector<8x32xf32>,
    %109 = vector.extract_strided_slice %15 {offsets = [24, 0], sizes = [8, 192], strides = [1, 1]} : vector<64x192xf32> to vector<8x192xf32>
    %110 = vector.extract_strided_slice %15 {offsets = [32, 0], sizes = [8, 192], strides = [1, 1]} : vector<64x192xf32> to vector<8x192xf32>
    %111 = arith.select %4, %109, %110 : vector<8x192xi1>, vector<8x192xf32>
    %cst_23 = arith.constant dense<0.000000e+00> : vector<8x192xf32>
    %112 = tpu.matmul %104, %16, %cst_23 {dimension_numbers = #tpu.dot_dimension_numbers<[1], [0], [0], [1], [0, 0, 1, 1], [], []>} : vector<8x64xf32>, vector<64x192xf32>, vector<8x192xf32> -> vector<8x192xf32>
    %113 = vector.broadcast %17 : vector<1x192xf32> to vector<8x192xf32>
    %114 = arith.addf %112, %113 : vector<8x192xf32>
    %115 = vector.extract_strided_slice %111 {offsets = [0, 0], sizes = [8, 128], strides = [1, 1]} : vector<8x192xf32> to vector<8x128xf32>
    %116 = vector.extract_strided_slice %114 {offsets = [0, 0], sizes = [8, 128], strides = [1, 1]} : vector<8x192xf32> to vector<8x128xf32>
    %117 = arith.addf %115, %116 : vector<8x128xf32>
    %118 = arith.negf %117 : vector<8x128xf32>
    %119 = math.exp %118 : vector<8x128xf32>
    %cst_24 = arith.constant 1.000000e+00 : f32
    %120 = vector.broadcast %cst_24 : f32 to vector<8x128xf32>
    %121 = arith.addf %120, %119 : vector<8x128xf32>
    %122 = arith.divf %120, %121 : vector<8x128xf32>
    %123 = vector.extract_strided_slice %122 {offsets = [0, 0], sizes = [8, 64], strides = [1, 1]} : vector<8x128xf32> to vector<8x64xf32>
    %124 = vector.extract_strided_slice %122 {offsets = [0, 64], sizes = [8, 64], strides = [1, 1]} : vector<8x128xf32> to vector<8x64xf32>
    %125 = vector.extract_strided_slice %111 {offsets = [0, 128], sizes = [8, 64], strides = [1, 1]} : vector<8x192xf32> to vector<8x64xf32>
    %126 = vector.extract_strided_slice %114 {offsets = [0, 128], sizes = [8, 64], strides = [1, 1]} : vector<8x192xf32> to vector<8x64xf32>
    %127 = arith.mulf %123, %126 : vector<8x64xf32>
    %128 = arith.addf %125, %127 : vector<8x64xf32>
    %129 = math.tanh %128 : vector<8x64xf32>
    %cst_25 = arith.constant 1.000000e+00 : f32
    %130 = vector.broadcast %cst_25 : f32 to vector<8x64xf32>
    %131 = arith.subf %130, %124 : vector<8x64xf32>
    %132 = arith.mulf %131, %129 : vector<8x64xf32>
    %133 = arith.mulf %124, %104 : vector<8x64xf32>
    %134 = arith.addf %132, %133 : vector<8x64xf32>
    %135 = vector.extract_strided_slice %134 {offsets = [0, 0], sizes = [8, 32], strides = [1, 1]} : vector<8x64xf32> to vector<8x32xf32>
    %c24 = arith.constant 24 : index
    %c0_26 = arith.constant 0 : index
    %136 = vector.load %arg3[%c24, %c0_26] : memref<64x64xf32, #tpu.memory_space<vmem>>, vector<8x32xf32>
    tpu.vector_store %arg3[%c24, %c0_26], %135 {strides = array<i32>} : memref<64x64xf32, #tpu.memory_space<vmem>>, vector<8x32xf32>,
    %137 = vector.extract_strided_slice %134 {offsets = [0, 32], sizes = [8, 32], strides = [1, 1]} : vector<8x64xf32> to vector<8x32xf32>
    %c32_27 = arith.constant 32 : index
    %c32_28 = arith.constant 32 : index
    %138 = vector.load %arg3[%c32_27, %c32_28] : memref<64x64xf32, #tpu.memory_space<vmem>>, vector<8x32xf32>
    tpu.vector_store %arg3[%c32_27, %c32_28], %137 {strides = array<i32>} : memref<64x64xf32, #tpu.memory_space<vmem>>, vector<8x32xf32>,
    %139 = vector.extract_strided_slice %15 {offsets = [32, 0], sizes = [8, 192], strides = [1, 1]} : vector<64x192xf32> to vector<8x192xf32>
    %140 = vector.extract_strided_slice %15 {offsets = [24, 0], sizes = [8, 192], strides = [1, 1]} : vector<64x192xf32> to vector<8x192xf32>
    %141 = arith.select %4, %139, %140 : vector<8x192xi1>, vector<8x192xf32>
    %cst_29 = arith.constant dense<0.000000e+00> : vector<8x192xf32>
    %142 = tpu.matmul %134, %16, %cst_29 {dimension_numbers = #tpu.dot_dimension_numbers<[1], [0], [0], [1], [0, 0, 1, 1], [], []>} : vector<8x64xf32>, vector<64x192xf32>, vector<8x192xf32> -> vector<8x192xf32>
    %143 = vector.broadcast %17 : vector<1x192xf32> to vector<8x192xf32>
    %144 = arith.addf %142, %143 : vector<8x192xf32>
    %145 = vector.extract_strided_slice %141 {offsets = [0, 0], sizes = [8, 128], strides = [1, 1]} : vector<8x192xf32> to vector<8x128xf32>
    %146 = vector.extract_strided_slice %144 {offsets = [0, 0], sizes = [8, 128], strides = [1, 1]} : vector<8x192xf32> to vector<8x128xf32>
    %147 = arith.addf %145, %146 : vector<8x128xf32>
    %148 = arith.negf %147 : vector<8x128xf32>
    %149 = math.exp %148 : vector<8x128xf32>
    %cst_30 = arith.constant 1.000000e+00 : f32
    %150 = vector.broadcast %cst_30 : f32 to vector<8x128xf32>
    %151 = arith.addf %150, %149 : vector<8x128xf32>
    %152 = arith.divf %150, %151 : vector<8x128xf32>
    %153 = vector.extract_strided_slice %152 {offsets = [0, 0], sizes = [8, 64], strides = [1, 1]} : vector<8x128xf32> to vector<8x64xf32>
    %154 = vector.extract_strided_slice %152 {offsets = [0, 64], sizes = [8, 64], strides = [1, 1]} : vector<8x128xf32> to vector<8x64xf32>
    %155 = vector.extract_strided_slice %141 {offsets = [0, 128], sizes = [8, 64], strides = [1, 1]} : vector<8x192xf32> to vector<8x64xf32>
    %156 = vector.extract_strided_slice %144 {offsets = [0, 128], sizes = [8, 64], strides = [1, 1]} : vector<8x192xf32> to vector<8x64xf32>
    %157 = arith.mulf %153, %156 : vector<8x64xf32>
    %158 = arith.addf %155, %157 : vector<8x64xf32>
    %159 = math.tanh %158 : vector<8x64xf32>
    %cst_31 = arith.constant 1.000000e+00 : f32
    %160 = vector.broadcast %cst_31 : f32 to vector<8x64xf32>
    %161 = arith.subf %160, %154 : vector<8x64xf32>
    %162 = arith.mulf %161, %159 : vector<8x64xf32>
    %163 = arith.mulf %154, %134 : vector<8x64xf32>
    %164 = arith.addf %162, %163 : vector<8x64xf32>
    %165 = vector.extract_strided_slice %164 {offsets = [0, 0], sizes = [8, 32], strides = [1, 1]} : vector<8x64xf32> to vector<8x32xf32>
    %c32_32 = arith.constant 32 : index
    %c0_33 = arith.constant 0 : index
    %166 = vector.load %arg3[%c32_32, %c0_33] : memref<64x64xf32, #tpu.memory_space<vmem>>, vector<8x32xf32>
    tpu.vector_store %arg3[%c32_32, %c0_33], %165 {strides = array<i32>} : memref<64x64xf32, #tpu.memory_space<vmem>>, vector<8x32xf32>,
    %167 = vector.extract_strided_slice %164 {offsets = [0, 32], sizes = [8, 32], strides = [1, 1]} : vector<8x64xf32> to vector<8x32xf32>
    %c24_34 = arith.constant 24 : index
    %c32_35 = arith.constant 32 : index
    %168 = vector.load %arg3[%c24_34, %c32_35] : memref<64x64xf32, #tpu.memory_space<vmem>>, vector<8x32xf32>
    tpu.vector_store %arg3[%c24_34, %c32_35], %167 {strides = array<i32>} : memref<64x64xf32, #tpu.memory_space<vmem>>, vector<8x32xf32>,
    %169 = vector.extract_strided_slice %15 {offsets = [40, 0], sizes = [8, 192], strides = [1, 1]} : vector<64x192xf32> to vector<8x192xf32>
    %170 = vector.extract_strided_slice %15 {offsets = [16, 0], sizes = [8, 192], strides = [1, 1]} : vector<64x192xf32> to vector<8x192xf32>
    %171 = arith.select %4, %169, %170 : vector<8x192xi1>, vector<8x192xf32>
    %cst_36 = arith.constant dense<0.000000e+00> : vector<8x192xf32>
    %172 = tpu.matmul %164, %16, %cst_36 {dimension_numbers = #tpu.dot_dimension_numbers<[1], [0], [0], [1], [0, 0, 1, 1], [], []>} : vector<8x64xf32>, vector<64x192xf32>, vector<8x192xf32> -> vector<8x192xf32>
    %173 = vector.broadcast %17 : vector<1x192xf32> to vector<8x192xf32>
    %174 = arith.addf %172, %173 : vector<8x192xf32>
    %175 = vector.extract_strided_slice %171 {offsets = [0, 0], sizes = [8, 128], strides = [1, 1]} : vector<8x192xf32> to vector<8x128xf32>
    %176 = vector.extract_strided_slice %174 {offsets = [0, 0], sizes = [8, 128], strides = [1, 1]} : vector<8x192xf32> to vector<8x128xf32>
    %177 = arith.addf %175, %176 : vector<8x128xf32>
    %178 = arith.negf %177 : vector<8x128xf32>
    %179 = math.exp %178 : vector<8x128xf32>
    %cst_37 = arith.constant 1.000000e+00 : f32
    %180 = vector.broadcast %cst_37 : f32 to vector<8x128xf32>
    %181 = arith.addf %180, %179 : vector<8x128xf32>
    %182 = arith.divf %180, %181 : vector<8x128xf32>
    %183 = vector.extract_strided_slice %182 {offsets = [0, 0], sizes = [8, 64], strides = [1, 1]} : vector<8x128xf32> to vector<8x64xf32>
    %184 = vector.extract_strided_slice %182 {offsets = [0, 64], sizes = [8, 64], strides = [1, 1]} : vector<8x128xf32> to vector<8x64xf32>
    %185 = vector.extract_strided_slice %171 {offsets = [0, 128], sizes = [8, 64], strides = [1, 1]} : vector<8x192xf32> to vector<8x64xf32>
    %186 = vector.extract_strided_slice %174 {offsets = [0, 128], sizes = [8, 64], strides = [1, 1]} : vector<8x192xf32> to vector<8x64xf32>
    %187 = arith.mulf %183, %186 : vector<8x64xf32>
    %188 = arith.addf %185, %187 : vector<8x64xf32>
    %189 = math.tanh %188 : vector<8x64xf32>
    %cst_38 = arith.constant 1.000000e+00 : f32
    %190 = vector.broadcast %cst_38 : f32 to vector<8x64xf32>
    %191 = arith.subf %190, %184 : vector<8x64xf32>
    %192 = arith.mulf %191, %189 : vector<8x64xf32>
    %193 = arith.mulf %184, %164 : vector<8x64xf32>
    %194 = arith.addf %192, %193 : vector<8x64xf32>
    %195 = vector.extract_strided_slice %194 {offsets = [0, 0], sizes = [8, 32], strides = [1, 1]} : vector<8x64xf32> to vector<8x32xf32>
    %c40_39 = arith.constant 40 : index
    %c0_40 = arith.constant 0 : index
    %196 = vector.load %arg3[%c40_39, %c0_40] : memref<64x64xf32, #tpu.memory_space<vmem>>, vector<8x32xf32>
    tpu.vector_store %arg3[%c40_39, %c0_40], %195 {strides = array<i32>} : memref<64x64xf32, #tpu.memory_space<vmem>>, vector<8x32xf32>,
    %197 = vector.extract_strided_slice %194 {offsets = [0, 32], sizes = [8, 32], strides = [1, 1]} : vector<8x64xf32> to vector<8x32xf32>
    %c16_41 = arith.constant 16 : index
    %c32_42 = arith.constant 32 : index
    %198 = vector.load %arg3[%c16_41, %c32_42] : memref<64x64xf32, #tpu.memory_space<vmem>>, vector<8x32xf32>
    tpu.vector_store %arg3[%c16_41, %c32_42], %197 {strides = array<i32>} : memref<64x64xf32, #tpu.memory_space<vmem>>, vector<8x32xf32>,
    %199 = vector.extract_strided_slice %15 {offsets = [48, 0], sizes = [8, 192], strides = [1, 1]} : vector<64x192xf32> to vector<8x192xf32>
    %200 = vector.extract_strided_slice %15 {offsets = [8, 0], sizes = [8, 192], strides = [1, 1]} : vector<64x192xf32> to vector<8x192xf32>
    %201 = arith.select %4, %199, %200 : vector<8x192xi1>, vector<8x192xf32>
    %cst_43 = arith.constant dense<0.000000e+00> : vector<8x192xf32>
    %202 = tpu.matmul %194, %16, %cst_43 {dimension_numbers = #tpu.dot_dimension_numbers<[1], [0], [0], [1], [0, 0, 1, 1], [], []>} : vector<8x64xf32>, vector<64x192xf32>, vector<8x192xf32> -> vector<8x192xf32>
    %203 = vector.broadcast %17 : vector<1x192xf32> to vector<8x192xf32>
    %204 = arith.addf %202, %203 : vector<8x192xf32>
    %205 = vector.extract_strided_slice %201 {offsets = [0, 0], sizes = [8, 128], strides = [1, 1]} : vector<8x192xf32> to vector<8x128xf32>
    %206 = vector.extract_strided_slice %204 {offsets = [0, 0], sizes = [8, 128], strides = [1, 1]} : vector<8x192xf32> to vector<8x128xf32>
    %207 = arith.addf %205, %206 : vector<8x128xf32>
    %208 = arith.negf %207 : vector<8x128xf32>
    %209 = math.exp %208 : vector<8x128xf32>
    %cst_44 = arith.constant 1.000000e+00 : f32
    %210 = vector.broadcast %cst_44 : f32 to vector<8x128xf32>
    %211 = arith.addf %210, %209 : vector<8x128xf32>
    %212 = arith.divf %210, %211 : vector<8x128xf32>
    %213 = vector.extract_strided_slice %212 {offsets = [0, 0], sizes = [8, 64], strides = [1, 1]} : vector<8x128xf32> to vector<8x64xf32>
    %214 = vector.extract_strided_slice %212 {offsets = [0, 64], sizes = [8, 64], strides = [1, 1]} : vector<8x128xf32> to vector<8x64xf32>
    %215 = vector.extract_strided_slice %201 {offsets = [0, 128], sizes = [8, 64], strides = [1, 1]} : vector<8x192xf32> to vector<8x64xf32>
    %216 = vector.extract_strided_slice %204 {offsets = [0, 128], sizes = [8, 64], strides = [1, 1]} : vector<8x192xf32> to vector<8x64xf32>
    %217 = arith.mulf %213, %216 : vector<8x64xf32>
    %218 = arith.addf %215, %217 : vector<8x64xf32>
    %219 = math.tanh %218 : vector<8x64xf32>
    %cst_45 = arith.constant 1.000000e+00 : f32
    %220 = vector.broadcast %cst_45 : f32 to vector<8x64xf32>
    %221 = arith.subf %220, %214 : vector<8x64xf32>
    %222 = arith.mulf %221, %219 : vector<8x64xf32>
    %223 = arith.mulf %214, %194 : vector<8x64xf32>
    %224 = arith.addf %222, %223 : vector<8x64xf32>
    %225 = vector.extract_strided_slice %224 {offsets = [0, 0], sizes = [8, 32], strides = [1, 1]} : vector<8x64xf32> to vector<8x32xf32>
    %c48_46 = arith.constant 48 : index
    %c0_47 = arith.constant 0 : index
    %226 = vector.load %arg3[%c48_46, %c0_47] : memref<64x64xf32, #tpu.memory_space<vmem>>, vector<8x32xf32>
    tpu.vector_store %arg3[%c48_46, %c0_47], %225 {strides = array<i32>} : memref<64x64xf32, #tpu.memory_space<vmem>>, vector<8x32xf32>,
    %227 = vector.extract_strided_slice %224 {offsets = [0, 32], sizes = [8, 32], strides = [1, 1]} : vector<8x64xf32> to vector<8x32xf32>
    %c8_48 = arith.constant 8 : index
    %c32_49 = arith.constant 32 : index
    %228 = vector.load %arg3[%c8_48, %c32_49] : memref<64x64xf32, #tpu.memory_space<vmem>>, vector<8x32xf32>
    tpu.vector_store %arg3[%c8_48, %c32_49], %227 {strides = array<i32>} : memref<64x64xf32, #tpu.memory_space<vmem>>, vector<8x32xf32>,
    %229 = vector.extract_strided_slice %15 {offsets = [56, 0], sizes = [8, 192], strides = [1, 1]} : vector<64x192xf32> to vector<8x192xf32>
    %230 = vector.extract_strided_slice %15 {offsets = [0, 0], sizes = [8, 192], strides = [1, 1]} : vector<64x192xf32> to vector<8x192xf32>
    %231 = arith.select %4, %229, %230 : vector<8x192xi1>, vector<8x192xf32>
    %cst_50 = arith.constant dense<0.000000e+00> : vector<8x192xf32>
    %232 = tpu.matmul %224, %16, %cst_50 {dimension_numbers = #tpu.dot_dimension_numbers<[1], [0], [0], [1], [0, 0, 1, 1], [], []>} : vector<8x64xf32>, vector<64x192xf32>, vector<8x192xf32> -> vector<8x192xf32>
    %233 = vector.broadcast %17 : vector<1x192xf32> to vector<8x192xf32>
    %234 = arith.addf %232, %233 : vector<8x192xf32>
    %235 = vector.extract_strided_slice %231 {offsets = [0, 0], sizes = [8, 128], strides = [1, 1]} : vector<8x192xf32> to vector<8x128xf32>
    %236 = vector.extract_strided_slice %234 {offsets = [0, 0], sizes = [8, 128], strides = [1, 1]} : vector<8x192xf32> to vector<8x128xf32>
    %237 = arith.addf %235, %236 : vector<8x128xf32>
    %238 = arith.negf %237 : vector<8x128xf32>
    %239 = math.exp %238 : vector<8x128xf32>
    %cst_51 = arith.constant 1.000000e+00 : f32
    %240 = vector.broadcast %cst_51 : f32 to vector<8x128xf32>
    %241 = arith.addf %240, %239 : vector<8x128xf32>
    %242 = arith.divf %240, %241 : vector<8x128xf32>
    %243 = vector.extract_strided_slice %242 {offsets = [0, 0], sizes = [8, 64], strides = [1, 1]} : vector<8x128xf32> to vector<8x64xf32>
    %244 = vector.extract_strided_slice %242 {offsets = [0, 64], sizes = [8, 64], strides = [1, 1]} : vector<8x128xf32> to vector<8x64xf32>
    %245 = vector.extract_strided_slice %231 {offsets = [0, 128], sizes = [8, 64], strides = [1, 1]} : vector<8x192xf32> to vector<8x64xf32>
    %246 = vector.extract_strided_slice %234 {offsets = [0, 128], sizes = [8, 64], strides = [1, 1]} : vector<8x192xf32> to vector<8x64xf32>
    %247 = arith.mulf %243, %246 : vector<8x64xf32>
    %248 = arith.addf %245, %247 : vector<8x64xf32>
    %249 = math.tanh %248 : vector<8x64xf32>
    %cst_52 = arith.constant 1.000000e+00 : f32
    %250 = vector.broadcast %cst_52 : f32 to vector<8x64xf32>
    %251 = arith.subf %250, %244 : vector<8x64xf32>
    %252 = arith.mulf %251, %249 : vector<8x64xf32>
    %253 = arith.mulf %244, %224 : vector<8x64xf32>
    %254 = arith.addf %252, %253 : vector<8x64xf32>
    %255 = vector.extract_strided_slice %254 {offsets = [0, 0], sizes = [8, 32], strides = [1, 1]} : vector<8x64xf32> to vector<8x32xf32>
    %c56_53 = arith.constant 56 : index
    %c0_54 = arith.constant 0 : index
    %256 = vector.load %arg3[%c56_53, %c0_54] : memref<64x64xf32, #tpu.memory_space<vmem>>, vector<8x32xf32>
    tpu.vector_store %arg3[%c56_53, %c0_54], %255 {strides = array<i32>} : memref<64x64xf32, #tpu.memory_space<vmem>>, vector<8x32xf32>,
    %257 = vector.extract_strided_slice %254 {offsets = [0, 32], sizes = [8, 32], strides = [1, 1]} : vector<8x64xf32> to vector<8x32xf32>
    %c0_55 = arith.constant 0 : index
    %c32_56 = arith.constant 32 : index
    %258 = vector.load %arg3[%c0_55, %c32_56] : memref<64x64xf32, #tpu.memory_space<vmem>>, vector<8x32xf32>
    tpu.vector_store %arg3[%c0_55, %c32_56], %257 {strides = array<i32>} : memref<64x64xf32, #tpu.memory_space<vmem>>, vector<8x32xf32>,
    %c0_57 = arith.constant 0 : index
    %c0_58 = arith.constant 0 : index
    %259 = vector.load %arg3[%c0_57, %c0_58] : memref<64x64xf32, #tpu.memory_space<vmem>>, vector<64x64xf32>
    %c136 = arith.constant 136 : index
    %c0_59 = arith.constant 0 : index
    %260 = vector.load %arg1[%c136, %c0_59] : memref<352x192xf32, #tpu.memory_space<vmem>>, vector<64x192xf32>
    %cst_60 = arith.constant dense<0.000000e+00> : vector<64x192xf32>
    %261 = tpu.matmul %259, %260, %cst_60 {dimension_numbers = #tpu.dot_dimension_numbers<[1], [0], [0], [1], [0, 0, 1, 1], [], []>} : vector<64x64xf32>, vector<64x192xf32>, vector<64x192xf32> -> vector<64x192xf32>
    %c200 = arith.constant 200 : index
    %c0_61 = arith.constant 0 : index
    %262 = vector.load %arg1[%c200, %c0_61] : memref<352x192xf32, #tpu.memory_space<vmem>>, vector<1x192xf32>
    %263 = vector.broadcast %262 : vector<1x192xf32> to vector<64x192xf32>
    %264 = arith.addf %261, %263 : vector<64x192xf32>
    %c208 = arith.constant 208 : index
    %c0_62 = arith.constant 0 : index
    %265 = vector.load %arg1[%c208, %c0_62] : memref<352x192xf32, #tpu.memory_space<vmem>>, vector<64x192xf32>
    %c272 = arith.constant 272 : index
    %c0_63 = arith.constant 0 : index
    %266 = vector.load %arg1[%c272, %c0_63] : memref<352x192xf32, #tpu.memory_space<vmem>>, vector<1x192xf32>
    %cst_64 = arith.constant 0.000000e+00 : f32
    %267 = vector.broadcast %cst_64 : f32 to vector<8x64xf32>
    %268 = vector.extract_strided_slice %264 {offsets = [0, 0], sizes = [8, 192], strides = [1, 1]} : vector<64x192xf32> to vector<8x192xf32>
    %269 = vector.extract_strided_slice %264 {offsets = [56, 0], sizes = [8, 192], strides = [1, 1]} : vector<64x192xf32> to vector<8x192xf32>
    %270 = arith.select %4, %268, %269 : vector<8x192xi1>, vector<8x192xf32>
    %cst_65 = arith.constant dense<0.000000e+00> : vector<8x192xf32>
    %271 = tpu.matmul %267, %265, %cst_65 {dimension_numbers = #tpu.dot_dimension_numbers<[1], [0], [0], [1], [0, 0, 1, 1], [], []>} : vector<8x64xf32>, vector<64x192xf32>, vector<8x192xf32> -> vector<8x192xf32>
    %272 = vector.broadcast %266 : vector<1x192xf32> to vector<8x192xf32>
    %273 = arith.addf %271, %272 : vector<8x192xf32>
    %274 = vector.extract_strided_slice %270 {offsets = [0, 0], sizes = [8, 128], strides = [1, 1]} : vector<8x192xf32> to vector<8x128xf32>
    %275 = vector.extract_strided_slice %273 {offsets = [0, 0], sizes = [8, 128], strides = [1, 1]} : vector<8x192xf32> to vector<8x128xf32>
    %276 = arith.addf %274, %275 : vector<8x128xf32>
    %277 = arith.negf %276 : vector<8x128xf32>
    %278 = math.exp %277 : vector<8x128xf32>
    %cst_66 = arith.constant 1.000000e+00 : f32
    %279 = vector.broadcast %cst_66 : f32 to vector<8x128xf32>
    %280 = arith.addf %279, %278 : vector<8x128xf32>
    %281 = arith.divf %279, %280 : vector<8x128xf32>
    %282 = vector.extract_strided_slice %281 {offsets = [0, 0], sizes = [8, 64], strides = [1, 1]} : vector<8x128xf32> to vector<8x64xf32>
    %283 = vector.extract_strided_slice %281 {offsets = [0, 64], sizes = [8, 64], strides = [1, 1]} : vector<8x128xf32> to vector<8x64xf32>
    %284 = vector.extract_strided_slice %270 {offsets = [0, 128], sizes = [8, 64], strides = [1, 1]} : vector<8x192xf32> to vector<8x64xf32>
    %285 = vector.extract_strided_slice %273 {offsets = [0, 128], sizes = [8, 64], strides = [1, 1]} : vector<8x192xf32> to vector<8x64xf32>
    %286 = arith.mulf %282, %285 : vector<8x64xf32>
    %287 = arith.addf %284, %286 : vector<8x64xf32>
    %288 = math.tanh %287 : vector<8x64xf32>
    %cst_67 = arith.constant 1.000000e+00 : f32
    %289 = vector.broadcast %cst_67 : f32 to vector<8x64xf32>
    %290 = arith.subf %289, %283 : vector<8x64xf32>
    %291 = arith.mulf %290, %288 : vector<8x64xf32>
    %292 = arith.mulf %283, %267 : vector<8x64xf32>
    %293 = arith.addf %291, %292 : vector<8x64xf32>
    %294 = vector.extract_strided_slice %264 {offsets = [8, 0], sizes = [8, 192], strides = [1, 1]} : vector<64x192xf32> to vector<8x192xf32>
    %295 = vector.extract_strided_slice %264 {offsets = [48, 0], sizes = [8, 192], strides = [1, 1]} : vector<64x192xf32> to vector<8x192xf32>
    %296 = arith.select %4, %294, %295 : vector<8x192xi1>, vector<8x192xf32>
    %cst_68 = arith.constant dense<0.000000e+00> : vector<8x192xf32>
    %297 = tpu.matmul %293, %265, %cst_68 {dimension_numbers = #tpu.dot_dimension_numbers<[1], [0], [0], [1], [0, 0, 1, 1], [], []>} : vector<8x64xf32>, vector<64x192xf32>, vector<8x192xf32> -> vector<8x192xf32>
    %298 = vector.broadcast %266 : vector<1x192xf32> to vector<8x192xf32>
    %299 = arith.addf %297, %298 : vector<8x192xf32>
    %300 = vector.extract_strided_slice %296 {offsets = [0, 0], sizes = [8, 128], strides = [1, 1]} : vector<8x192xf32> to vector<8x128xf32>
    %301 = vector.extract_strided_slice %299 {offsets = [0, 0], sizes = [8, 128], strides = [1, 1]} : vector<8x192xf32> to vector<8x128xf32>
    %302 = arith.addf %300, %301 : vector<8x128xf32>
    %303 = arith.negf %302 : vector<8x128xf32>
    %304 = math.exp %303 : vector<8x128xf32>
    %cst_69 = arith.constant 1.000000e+00 : f32
    %305 = vector.broadcast %cst_69 : f32 to vector<8x128xf32>
    %306 = arith.addf %305, %304 : vector<8x128xf32>
    %307 = arith.divf %305, %306 : vector<8x128xf32>
    %308 = vector.extract_strided_slice %307 {offsets = [0, 0], sizes = [8, 64], strides = [1, 1]} : vector<8x128xf32> to vector<8x64xf32>
    %309 = vector.extract_strided_slice %307 {offsets = [0, 64], sizes = [8, 64], strides = [1, 1]} : vector<8x128xf32> to vector<8x64xf32>
    %310 = vector.extract_strided_slice %296 {offsets = [0, 128], sizes = [8, 64], strides = [1, 1]} : vector<8x192xf32> to vector<8x64xf32>
    %311 = vector.extract_strided_slice %299 {offsets = [0, 128], sizes = [8, 64], strides = [1, 1]} : vector<8x192xf32> to vector<8x64xf32>
    %312 = arith.mulf %308, %311 : vector<8x64xf32>
    %313 = arith.addf %310, %312 : vector<8x64xf32>
    %314 = math.tanh %313 : vector<8x64xf32>
    %cst_70 = arith.constant 1.000000e+00 : f32
    %315 = vector.broadcast %cst_70 : f32 to vector<8x64xf32>
    %316 = arith.subf %315, %309 : vector<8x64xf32>
    %317 = arith.mulf %316, %314 : vector<8x64xf32>
    %318 = arith.mulf %309, %293 : vector<8x64xf32>
    %319 = arith.addf %317, %318 : vector<8x64xf32>
    %320 = vector.extract_strided_slice %264 {offsets = [16, 0], sizes = [8, 192], strides = [1, 1]} : vector<64x192xf32> to vector<8x192xf32>
    %321 = vector.extract_strided_slice %264 {offsets = [40, 0], sizes = [8, 192], strides = [1, 1]} : vector<64x192xf32> to vector<8x192xf32>
    %322 = arith.select %4, %320, %321 : vector<8x192xi1>, vector<8x192xf32>
    %cst_71 = arith.constant dense<0.000000e+00> : vector<8x192xf32>
    %323 = tpu.matmul %319, %265, %cst_71 {dimension_numbers = #tpu.dot_dimension_numbers<[1], [0], [0], [1], [0, 0, 1, 1], [], []>} : vector<8x64xf32>, vector<64x192xf32>, vector<8x192xf32> -> vector<8x192xf32>
    %324 = vector.broadcast %266 : vector<1x192xf32> to vector<8x192xf32>
    %325 = arith.addf %323, %324 : vector<8x192xf32>
    %326 = vector.extract_strided_slice %322 {offsets = [0, 0], sizes = [8, 128], strides = [1, 1]} : vector<8x192xf32> to vector<8x128xf32>
    %327 = vector.extract_strided_slice %325 {offsets = [0, 0], sizes = [8, 128], strides = [1, 1]} : vector<8x192xf32> to vector<8x128xf32>
    %328 = arith.addf %326, %327 : vector<8x128xf32>
    %329 = arith.negf %328 : vector<8x128xf32>
    %330 = math.exp %329 : vector<8x128xf32>
    %cst_72 = arith.constant 1.000000e+00 : f32
    %331 = vector.broadcast %cst_72 : f32 to vector<8x128xf32>
    %332 = arith.addf %331, %330 : vector<8x128xf32>
    %333 = arith.divf %331, %332 : vector<8x128xf32>
    %334 = vector.extract_strided_slice %333 {offsets = [0, 0], sizes = [8, 64], strides = [1, 1]} : vector<8x128xf32> to vector<8x64xf32>
    %335 = vector.extract_strided_slice %333 {offsets = [0, 64], sizes = [8, 64], strides = [1, 1]} : vector<8x128xf32> to vector<8x64xf32>
    %336 = vector.extract_strided_slice %322 {offsets = [0, 128], sizes = [8, 64], strides = [1, 1]} : vector<8x192xf32> to vector<8x64xf32>
    %337 = vector.extract_strided_slice %325 {offsets = [0, 128], sizes = [8, 64], strides = [1, 1]} : vector<8x192xf32> to vector<8x64xf32>
    %338 = arith.mulf %334, %337 : vector<8x64xf32>
    %339 = arith.addf %336, %338 : vector<8x64xf32>
    %340 = math.tanh %339 : vector<8x64xf32>
    %cst_73 = arith.constant 1.000000e+00 : f32
    %341 = vector.broadcast %cst_73 : f32 to vector<8x64xf32>
    %342 = arith.subf %341, %335 : vector<8x64xf32>
    %343 = arith.mulf %342, %340 : vector<8x64xf32>
    %344 = arith.mulf %335, %319 : vector<8x64xf32>
    %345 = arith.addf %343, %344 : vector<8x64xf32>
    %346 = vector.extract_strided_slice %264 {offsets = [24, 0], sizes = [8, 192], strides = [1, 1]} : vector<64x192xf32> to vector<8x192xf32>
    %347 = vector.extract_strided_slice %264 {offsets = [32, 0], sizes = [8, 192], strides = [1, 1]} : vector<64x192xf32> to vector<8x192xf32>
    %348 = arith.select %4, %346, %347 : vector<8x192xi1>, vector<8x192xf32>
    %cst_74 = arith.constant dense<0.000000e+00> : vector<8x192xf32>
    %349 = tpu.matmul %345, %265, %cst_74 {dimension_numbers = #tpu.dot_dimension_numbers<[1], [0], [0], [1], [0, 0, 1, 1], [], []>} : vector<8x64xf32>, vector<64x192xf32>, vector<8x192xf32> -> vector<8x192xf32>
    %350 = vector.broadcast %266 : vector<1x192xf32> to vector<8x192xf32>
    %351 = arith.addf %349, %350 : vector<8x192xf32>
    %352 = vector.extract_strided_slice %348 {offsets = [0, 0], sizes = [8, 128], strides = [1, 1]} : vector<8x192xf32> to vector<8x128xf32>
    %353 = vector.extract_strided_slice %351 {offsets = [0, 0], sizes = [8, 128], strides = [1, 1]} : vector<8x192xf32> to vector<8x128xf32>
    %354 = arith.addf %352, %353 : vector<8x128xf32>
    %355 = arith.negf %354 : vector<8x128xf32>
    %356 = math.exp %355 : vector<8x128xf32>
    %cst_75 = arith.constant 1.000000e+00 : f32
    %357 = vector.broadcast %cst_75 : f32 to vector<8x128xf32>
    %358 = arith.addf %357, %356 : vector<8x128xf32>
    %359 = arith.divf %357, %358 : vector<8x128xf32>
    %360 = vector.extract_strided_slice %359 {offsets = [0, 0], sizes = [8, 64], strides = [1, 1]} : vector<8x128xf32> to vector<8x64xf32>
    %361 = vector.extract_strided_slice %359 {offsets = [0, 64], sizes = [8, 64], strides = [1, 1]} : vector<8x128xf32> to vector<8x64xf32>
    %362 = vector.extract_strided_slice %348 {offsets = [0, 128], sizes = [8, 64], strides = [1, 1]} : vector<8x192xf32> to vector<8x64xf32>
    %363 = vector.extract_strided_slice %351 {offsets = [0, 128], sizes = [8, 64], strides = [1, 1]} : vector<8x192xf32> to vector<8x64xf32>
    %364 = arith.mulf %360, %363 : vector<8x64xf32>
    %365 = arith.addf %362, %364 : vector<8x64xf32>
    %366 = math.tanh %365 : vector<8x64xf32>
    %cst_76 = arith.constant 1.000000e+00 : f32
    %367 = vector.broadcast %cst_76 : f32 to vector<8x64xf32>
    %368 = arith.subf %367, %361 : vector<8x64xf32>
    %369 = arith.mulf %368, %366 : vector<8x64xf32>
    %370 = arith.mulf %361, %345 : vector<8x64xf32>
    %371 = arith.addf %369, %370 : vector<8x64xf32>
    %372 = vector.extract_strided_slice %264 {offsets = [32, 0], sizes = [8, 192], strides = [1, 1]} : vector<64x192xf32> to vector<8x192xf32>
    %373 = vector.extract_strided_slice %264 {offsets = [24, 0], sizes = [8, 192], strides = [1, 1]} : vector<64x192xf32> to vector<8x192xf32>
    %374 = arith.select %4, %372, %373 : vector<8x192xi1>, vector<8x192xf32>
    %cst_77 = arith.constant dense<0.000000e+00> : vector<8x192xf32>
    %375 = tpu.matmul %371, %265, %cst_77 {dimension_numbers = #tpu.dot_dimension_numbers<[1], [0], [0], [1], [0, 0, 1, 1], [], []>} : vector<8x64xf32>, vector<64x192xf32>, vector<8x192xf32> -> vector<8x192xf32>
    %376 = vector.broadcast %266 : vector<1x192xf32> to vector<8x192xf32>
    %377 = arith.addf %375, %376 : vector<8x192xf32>
    %378 = vector.extract_strided_slice %374 {offsets = [0, 0], sizes = [8, 128], strides = [1, 1]} : vector<8x192xf32> to vector<8x128xf32>
    %379 = vector.extract_strided_slice %377 {offsets = [0, 0], sizes = [8, 128], strides = [1, 1]} : vector<8x192xf32> to vector<8x128xf32>
    %380 = arith.addf %378, %379 : vector<8x128xf32>
    %381 = arith.negf %380 : vector<8x128xf32>
    %382 = math.exp %381 : vector<8x128xf32>
    %cst_78 = arith.constant 1.000000e+00 : f32
    %383 = vector.broadcast %cst_78 : f32 to vector<8x128xf32>
    %384 = arith.addf %383, %382 : vector<8x128xf32>
    %385 = arith.divf %383, %384 : vector<8x128xf32>
    %386 = vector.extract_strided_slice %385 {offsets = [0, 0], sizes = [8, 64], strides = [1, 1]} : vector<8x128xf32> to vector<8x64xf32>
    %387 = vector.extract_strided_slice %385 {offsets = [0, 64], sizes = [8, 64], strides = [1, 1]} : vector<8x128xf32> to vector<8x64xf32>
    %388 = vector.extract_strided_slice %374 {offsets = [0, 128], sizes = [8, 64], strides = [1, 1]} : vector<8x192xf32> to vector<8x64xf32>
    %389 = vector.extract_strided_slice %377 {offsets = [0, 128], sizes = [8, 64], strides = [1, 1]} : vector<8x192xf32> to vector<8x64xf32>
    %390 = arith.mulf %386, %389 : vector<8x64xf32>
    %391 = arith.addf %388, %390 : vector<8x64xf32>
    %392 = math.tanh %391 : vector<8x64xf32>
    %cst_79 = arith.constant 1.000000e+00 : f32
    %393 = vector.broadcast %cst_79 : f32 to vector<8x64xf32>
    %394 = arith.subf %393, %387 : vector<8x64xf32>
    %395 = arith.mulf %394, %392 : vector<8x64xf32>
    %396 = arith.mulf %387, %371 : vector<8x64xf32>
    %397 = arith.addf %395, %396 : vector<8x64xf32>
    %398 = vector.extract_strided_slice %264 {offsets = [40, 0], sizes = [8, 192], strides = [1, 1]} : vector<64x192xf32> to vector<8x192xf32>
    %399 = vector.extract_strided_slice %264 {offsets = [16, 0], sizes = [8, 192], strides = [1, 1]} : vector<64x192xf32> to vector<8x192xf32>
    %400 = arith.select %4, %398, %399 : vector<8x192xi1>, vector<8x192xf32>
    %cst_80 = arith.constant dense<0.000000e+00> : vector<8x192xf32>
    %401 = tpu.matmul %397, %265, %cst_80 {dimension_numbers = #tpu.dot_dimension_numbers<[1], [0], [0], [1], [0, 0, 1, 1], [], []>} : vector<8x64xf32>, vector<64x192xf32>, vector<8x192xf32> -> vector<8x192xf32>
    %402 = vector.broadcast %266 : vector<1x192xf32> to vector<8x192xf32>
    %403 = arith.addf %401, %402 : vector<8x192xf32>
    %404 = vector.extract_strided_slice %400 {offsets = [0, 0], sizes = [8, 128], strides = [1, 1]} : vector<8x192xf32> to vector<8x128xf32>
    %405 = vector.extract_strided_slice %403 {offsets = [0, 0], sizes = [8, 128], strides = [1, 1]} : vector<8x192xf32> to vector<8x128xf32>
    %406 = arith.addf %404, %405 : vector<8x128xf32>
    %407 = arith.negf %406 : vector<8x128xf32>
    %408 = math.exp %407 : vector<8x128xf32>
    %cst_81 = arith.constant 1.000000e+00 : f32
    %409 = vector.broadcast %cst_81 : f32 to vector<8x128xf32>
    %410 = arith.addf %409, %408 : vector<8x128xf32>
    %411 = arith.divf %409, %410 : vector<8x128xf32>
    %412 = vector.extract_strided_slice %411 {offsets = [0, 0], sizes = [8, 64], strides = [1, 1]} : vector<8x128xf32> to vector<8x64xf32>
    %413 = vector.extract_strided_slice %411 {offsets = [0, 64], sizes = [8, 64], strides = [1, 1]} : vector<8x128xf32> to vector<8x64xf32>
    %414 = vector.extract_strided_slice %400 {offsets = [0, 128], sizes = [8, 64], strides = [1, 1]} : vector<8x192xf32> to vector<8x64xf32>
    %415 = vector.extract_strided_slice %403 {offsets = [0, 128], sizes = [8, 64], strides = [1, 1]} : vector<8x192xf32> to vector<8x64xf32>
    %416 = arith.mulf %412, %415 : vector<8x64xf32>
    %417 = arith.addf %414, %416 : vector<8x64xf32>
    %418 = math.tanh %417 : vector<8x64xf32>
    %cst_82 = arith.constant 1.000000e+00 : f32
    %419 = vector.broadcast %cst_82 : f32 to vector<8x64xf32>
    %420 = arith.subf %419, %413 : vector<8x64xf32>
    %421 = arith.mulf %420, %418 : vector<8x64xf32>
    %422 = arith.mulf %413, %397 : vector<8x64xf32>
    %423 = arith.addf %421, %422 : vector<8x64xf32>
    %424 = vector.extract_strided_slice %264 {offsets = [48, 0], sizes = [8, 192], strides = [1, 1]} : vector<64x192xf32> to vector<8x192xf32>
    %425 = vector.extract_strided_slice %264 {offsets = [8, 0], sizes = [8, 192], strides = [1, 1]} : vector<64x192xf32> to vector<8x192xf32>
    %426 = arith.select %4, %424, %425 : vector<8x192xi1>, vector<8x192xf32>
    %cst_83 = arith.constant dense<0.000000e+00> : vector<8x192xf32>
    %427 = tpu.matmul %423, %265, %cst_83 {dimension_numbers = #tpu.dot_dimension_numbers<[1], [0], [0], [1], [0, 0, 1, 1], [], []>} : vector<8x64xf32>, vector<64x192xf32>, vector<8x192xf32> -> vector<8x192xf32>
    %428 = vector.broadcast %266 : vector<1x192xf32> to vector<8x192xf32>
    %429 = arith.addf %427, %428 : vector<8x192xf32>
    %430 = vector.extract_strided_slice %426 {offsets = [0, 0], sizes = [8, 128], strides = [1, 1]} : vector<8x192xf32> to vector<8x128xf32>
    %431 = vector.extract_strided_slice %429 {offsets = [0, 0], sizes = [8, 128], strides = [1, 1]} : vector<8x192xf32> to vector<8x128xf32>
    %432 = arith.addf %430, %431 : vector<8x128xf32>
    %433 = arith.negf %432 : vector<8x128xf32>
    %434 = math.exp %433 : vector<8x128xf32>
    %cst_84 = arith.constant 1.000000e+00 : f32
    %435 = vector.broadcast %cst_84 : f32 to vector<8x128xf32>
    %436 = arith.addf %435, %434 : vector<8x128xf32>
    %437 = arith.divf %435, %436 : vector<8x128xf32>
    %438 = vector.extract_strided_slice %437 {offsets = [0, 0], sizes = [8, 64], strides = [1, 1]} : vector<8x128xf32> to vector<8x64xf32>
    %439 = vector.extract_strided_slice %437 {offsets = [0, 64], sizes = [8, 64], strides = [1, 1]} : vector<8x128xf32> to vector<8x64xf32>
    %440 = vector.extract_strided_slice %426 {offsets = [0, 128], sizes = [8, 64], strides = [1, 1]} : vector<8x192xf32> to vector<8x64xf32>
    %441 = vector.extract_strided_slice %429 {offsets = [0, 128], sizes = [8, 64], strides = [1, 1]} : vector<8x192xf32> to vector<8x64xf32>
    %442 = arith.mulf %438, %441 : vector<8x64xf32>
    %443 = arith.addf %440, %442 : vector<8x64xf32>
    %444 = math.tanh %443 : vector<8x64xf32>
    %cst_85 = arith.constant 1.000000e+00 : f32
    %445 = vector.broadcast %cst_85 : f32 to vector<8x64xf32>
    %446 = arith.subf %445, %439 : vector<8x64xf32>
    %447 = arith.mulf %446, %444 : vector<8x64xf32>
    %448 = arith.mulf %439, %423 : vector<8x64xf32>
    %449 = arith.addf %447, %448 : vector<8x64xf32>
    %450 = vector.extract_strided_slice %264 {offsets = [56, 0], sizes = [8, 192], strides = [1, 1]} : vector<64x192xf32> to vector<8x192xf32>
    %451 = vector.extract_strided_slice %264 {offsets = [0, 0], sizes = [8, 192], strides = [1, 1]} : vector<64x192xf32> to vector<8x192xf32>
    %452 = arith.select %4, %450, %451 : vector<8x192xi1>, vector<8x192xf32>
    %cst_86 = arith.constant dense<0.000000e+00> : vector<8x192xf32>
    %453 = tpu.matmul %449, %265, %cst_86 {dimension_numbers = #tpu.dot_dimension_numbers<[1], [0], [0], [1], [0, 0, 1, 1], [], []>} : vector<8x64xf32>, vector<64x192xf32>, vector<8x192xf32> -> vector<8x192xf32>
    %454 = vector.broadcast %266 : vector<1x192xf32> to vector<8x192xf32>
    %455 = arith.addf %453, %454 : vector<8x192xf32>
    %456 = vector.extract_strided_slice %452 {offsets = [0, 0], sizes = [8, 128], strides = [1, 1]} : vector<8x192xf32> to vector<8x128xf32>
    %457 = vector.extract_strided_slice %455 {offsets = [0, 0], sizes = [8, 128], strides = [1, 1]} : vector<8x192xf32> to vector<8x128xf32>
    %458 = arith.addf %456, %457 : vector<8x128xf32>
    %459 = arith.negf %458 : vector<8x128xf32>
    %460 = math.exp %459 : vector<8x128xf32>
    %cst_87 = arith.constant 1.000000e+00 : f32
    %461 = vector.broadcast %cst_87 : f32 to vector<8x128xf32>
    %462 = arith.addf %461, %460 : vector<8x128xf32>
    %463 = arith.divf %461, %462 : vector<8x128xf32>
    %464 = vector.extract_strided_slice %463 {offsets = [0, 0], sizes = [8, 64], strides = [1, 1]} : vector<8x128xf32> to vector<8x64xf32>
    %465 = vector.extract_strided_slice %463 {offsets = [0, 64], sizes = [8, 64], strides = [1, 1]} : vector<8x128xf32> to vector<8x64xf32>
    %466 = vector.extract_strided_slice %452 {offsets = [0, 128], sizes = [8, 64], strides = [1, 1]} : vector<8x192xf32> to vector<8x64xf32>
    %467 = vector.extract_strided_slice %455 {offsets = [0, 128], sizes = [8, 64], strides = [1, 1]} : vector<8x192xf32> to vector<8x64xf32>
    %468 = arith.mulf %464, %467 : vector<8x64xf32>
    %469 = arith.addf %466, %468 : vector<8x64xf32>
    %470 = math.tanh %469 : vector<8x64xf32>
    %cst_88 = arith.constant 1.000000e+00 : f32
    %471 = vector.broadcast %cst_88 : f32 to vector<8x64xf32>
    %472 = arith.subf %471, %465 : vector<8x64xf32>
    %473 = arith.mulf %472, %470 : vector<8x64xf32>
    %474 = arith.mulf %465, %449 : vector<8x64xf32>
    %475 = arith.addf %473, %474 : vector<8x64xf32>
    %c280 = arith.constant 280 : index
    %c0_89 = arith.constant 0 : index
    %476 = vector.load %arg1[%c280, %c0_89] : memref<352x192xf32, #tpu.memory_space<vmem>>, vector<64x192xf32>
    %cst_90 = arith.constant dense<0.000000e+00> : vector<8x192xf32>
    %477 = tpu.matmul %475, %476, %cst_90 {dimension_numbers = #tpu.dot_dimension_numbers<[1], [0], [0], [1], [0, 0, 1, 1], [], []>} : vector<8x64xf32>, vector<64x192xf32>, vector<8x192xf32> -> vector<8x192xf32>
    %c344 = arith.constant 344 : index
    %c0_91 = arith.constant 0 : index
    %478 = vector.load %arg1[%c344, %c0_91] : memref<352x192xf32, #tpu.memory_space<vmem>>, vector<1x192xf32>
    %479 = vector.broadcast %478 : vector<1x192xf32> to vector<8x192xf32>
    %480 = arith.addf %477, %479 : vector<8x192xf32>
    %481 = vector.extract_strided_slice %480 {offsets = [0, 0], sizes = [4, 10], strides = [1, 1]} : vector<8x192xf32> to vector<4x10xf32>
    %c0_92 = arith.constant 0 : index
    %c0_93 = arith.constant 0 : index
    %482 = vector.load %arg2[%c0_92, %c0_93] : memref<4x10xf32, #tpu.memory_space<vmem>>, vector<4x10xf32>
    tpu.vector_store %arg2[%c0_92, %c0_93], %481 {strides = array<i32>} : memref<4x10xf32, #tpu.memory_space<vmem>>, vector<4x10xf32>,
    return
  }
}

</mosaic_0001>

<bundles_post_ra>
// kernel: encoder_forward.1
= control target key start
LH: loop header
LB: loop body
LE: loop exit
PB: predicated region body
PF: predicated region fallthrough
CT: control target
= control target key end

     0   :  { %v1932_v2 = vmov 0   ;;  %s3036_s0 = inlined_call_operand.vmem [shape: s32[64,1], index: 0, kind: input, shape index: {}]   ;;  %s3037_s1 = inlined_call_operand.vmem [shape: f32[352,192], index: 1, kind: input, shape index: {}]   ;;  %s3038_s2 = inlined_call_operand.hbm [shape: f32[4,10], index: 2, kind: output, shape index: {}]  }
   0x1   :  { %v21_v0 = vld [vmem:[%s3036_s0 + $0x10] sm:$0xff]  ;;  %v19_v1 = vld [vmem:[%s3036_s0] sm:$0xff]  ;;  %1808 = vset.pattern.permute.xlu1 %v1932_v2  ;;  %1807 = vset.pattern.permute.xlu0 %v1932_v2  ;;  %v88_v5 = vld [vmem:[%s3037_s1 + $0x68] sm:$0xff] }
   0x2   :  { %34 = vperm.xlu1 %1808, %v21_v0   ;;  %28 = vperm.xlu0 %1807, %v19_v1   ;;  %v23_v3 = vld [vmem:[%s3036_s0 + $0x20] sm:$0xff]  ;;  %v85_v6 = vld [vmem:[%s3037_s1 + $0x50] sm:$0xff]  ;;  %v86_v7 = vld [vmem:[%s3037_s1 + $0x58] sm:$0xff] }
   0x3   :  { %v87_v4 = vld [vmem:[%s3037_s1 + $0x60] sm:$0xff]  ;;  %1809 = vset.pattern.permute.xlu2 %v1932_v2  ;;  %171 = vmatpush.msra.mxu1 %v88_v5  ;;  %v84_v9 = vld [vmem:[%s3037_s1 + $0x48] sm:$0xff]  ;;  %v81_v10 = vld [vmem:[%s3037_s1 + $0x30] sm:$0xff] }
   0x4   :  { %130 = vmatpush.msra.mxu0 %v87_v4  ;;  %40 = vperm.xlu2 %1809, %v23_v3   ;;  %v83_v8 = vld [vmem:[%s3037_s1 + $0x40] sm:$0xff] }
   0x5   :  { %172 = vmatpush.msra.mxu1 %v86_v7 }
   0x6   :  { %131 = vmatpush.msra.mxu0 %v85_v6 }
   0x7   :  { %7 = vsyncpa [#allocation4], 0  ;;  %v22_v11 = vld [vmem:[%s3036_s0 + $0x18] sm:$0xff]  ;;  %v20_v12 = vld [vmem:[%s3036_s0 + $0x8] sm:$0xff]  ;;  %173 = vmatpush.msra.mxu1 %v84_v9  ;;  %v12_v23 = vlaneseq  ;;  %vm96_vm0 = vcmask 457728   ;;  %v3039_v26 = vmov 0.0  }
   0x8   :  { %132 = vmatpush.msra.mxu0 %v83_v8  ;;  %v82_v13 = vld [vmem:[%s3037_s1 + $0x38] sm:$0xff]  ;;  %v79_v14 = vld [vmem:[%s3037_s1 + $0x20] sm:$0xff]  ;;  %v24_v15 = vld [vmem:[%s3036_s0 + $0x28] sm:$0xff]  ;;  %s1934_s3 = smov 64   ;;  %vm228_vm15 = vcmask 523264   ;;  %s1935_s6 = smov [#allocation3]  }
   0x9   :  { %v80_v16 = vld [vmem:[%s3037_s1 + $0x28] sm:$0xff]  ;;  %v77_v17 = vld [vmem:[%s3037_s1 + $0x10] sm:$0xff]  ;;  %174 = vmatpush.msra.mxu1 %v82_v13  ;;  %v78_v18 = vld [vmem:[%s3037_s1 + $0x18] sm:$0xff]  ;;  %v2017_v24 = vand.u32 127, %v12_v23  ;;  %s1702_s7 = sshll.u32 %s1935_s6, 4  ;;  %s1704_s10 = sshll.u32 %s3038_s2, 4  ;;  %s1703_s7 = int_to_ptr.vmem [resolvable:$true] %s1702_s7  ;;  %s1705_s10 = int_to_ptr.hbm [resolvable:$true] %s1704_s10 }
   0xa   :  { %133 = vmatpush.msra.mxu0 %v81_v10  ;;  %37 = vperm.xlu1 %1808, %v22_v11   ;;  %v26_v19 = vld [vmem:[%s3036_s0 + $0x38] sm:$0xff]  ;;  %v25_v20 = vld [vmem:[%s3036_s0 + $0x30] sm:$0xff]  ;;  %v75_v21 = vld [vmem:[%s3037_s1] sm:$0xff] }
   0xb   :  { %31 = vperm.xlu0 %1807, %v20_v12   ;;  %175 = vmatpush.msra.mxu1 %v80_v16  ;;  %v76_v22 = vld [vmem:[%s3037_s1 + $0x8] sm:$0xff]  ;;  %v2026_v28 = vld [vmem:[%s3037_s1 + $0xf0] sm:$0xff]  ;;  %v2031_v29 = vld [vmem:[%s3037_s1 + $0xe0] sm:$0xff]  ;;  %v14_v9 = vadd.s32 128, %v2017_v24  ;;  %v15_v12 = vand.u32 63, %v2017_v24 }
   0xc   :  { %134 = vmatpush.msra.mxu0 %v79_v14  ;;  %43 = vperm.xlu2 %1809, %v24_v15   ;;  %v2042_v32 = vld [vmem:[%s3037_s1 + $0xd0] sm:$0xff]  ;;  %v2049_v33 = vld [vmem:[%s3037_s1 + $0xc0] sm:$0xff]  ;;  %v2099_v43 = vld [vmem:[%s3037_s1 + $0xf8] sm:$0xff] }
   0xd   :  { %176 = vmatpush.msra.mxu1 %v78_v18  ;;  %240 = vmatpush.msra.mxu2 %v2026_v28  ;;  %v2057_v35 = vld [vmem:[%s3037_s1 + $0xb0] sm:$0xff]  ;;  %v2064_v36 = vld [vmem:[%s3037_s1 + $0xa0] sm:$0xff]  ;;  %v2104_v44 = vld [vmem:[%s3037_s1 + $0xe8] sm:$0xff]  ;;  %v16_v13 = vand.u32 63, %v14_v9  ;;  %vm2234_vm10 = vcmp.lt.s32.totalorder %v15_v12, 32 }
   0xe   :  { %135 = vmatpush.msra.mxu0 %v77_v17  ;;  %v2073_v38 = vld [vmem:[%s3037_s1 + $0x90] sm:$0xff]  ;;  %v2081_v39 = vld [vmem:[%s3037_s1 + $0x80] sm:$0xff]  ;;  %260 = vmatpush.msra.mxu3 %v2099_v43  ;;  %v2112_v45 = vld [vmem:[%s3037_s1 + $0xd8] sm:$0xff] }
   0xf   :  { %177 = vmatpush.msra.mxu1 %v76_v22  ;;  %241 = vmatpush.msra.mxu2 %v2031_v29  ;;  %v2121_v46 = vld [vmem:[%s3037_s1 + $0xc8] sm:$0xff]  ;;  %v2131_v48 = vld [vmem:[%s3037_s1 + $0xb8] sm:$0xff]  ;;  %vm2230_vm9 = vcmp.lt.s32.totalorder %v16_v13, 32  ;;  %v1662_v15 = vld [vmem:[%s3037_s1 + $0x280] sm:$0xff] }
  0x10   :  { %136 = vmatpush.msra.mxu0 %v75_v21  ;;  %261 = vmatpush.msra.mxu3 %v2104_v44  ;;  %v2142_v49 = vld [vmem:[%s3037_s1 + $0xa8] sm:$0xff]  ;;  %v2149_v51 = vld [vmem:[%s3037_s1 + $0x98] sm:$0xff] }
  0x11   :  { %242 = vmatpush.msra.mxu2 %v2042_v32  ;;  %586 = vmatpush.msrb.mxu1 %v2099_v43  ;;  %v2159_v52 = vld [vmem:[%s3037_s1 + $0x88] sm:$0xff]  ;;  %v1721_v60 = vld [vmem:[%s3037_s1 + $0x70] ss:$8 sm:$0x3] }
  0x12   :  { %49 = vperm.xlu1 %1808, %v26_v19   ;;  %566 = vmatpush.msrb.mxu0 %v2026_v28  ;;  %v92_v61 = vperm.slane %v1721_v60, 0  ;;  %v93_v62 = vperm.slane %v1721_v60, 1 }
  0x13   :  { %46 = vperm.xlu0 %1807, %v25_v20   ;;  %243 = vmatpush.msra.mxu2 %v2049_v33 }
  0x14   :  { %567 = vmatpush.msrb.mxu0 %v2031_v29  ;;  %587 = vmatpush.msrb.mxu1 %v2104_v44 }
  0x15   :  { %244 = vmatpush.msra.mxu2 %v2057_v35  ;;  %262 = vmatpush.msra.mxu3 %v2112_v45 }
  0x16   :  { %568 = vmatpush.msrb.mxu0 %v2042_v32  ;;  %588 = vmatpush.msrb.mxu1 %v2112_v45 }
  0x17   :  { %245 = vmatpush.msra.mxu2 %v2064_v36  ;;  %263 = vmatpush.msra.mxu3 %v2121_v46 }
  0x18   :  { %569 = vmatpush.msrb.mxu0 %v2049_v33  ;;  %589 = vmatpush.msrb.mxu1 %v2121_v46 }
  0x19   :  { %246 = vmatpush.msra.mxu2 %v2073_v38  ;;  %264 = vmatpush.msra.mxu3 %v2131_v48 }
  0x1a   :  { %570 = vmatpush.msrb.mxu0 %v2057_v35  ;;  %590 = vmatpush.msrb.mxu1 %v2131_v48 }
  0x1b   :  { %247 = vmatpush.msra.mxu2 %v2081_v39  ;;  %265 = vmatpush.msra.mxu3 %v2142_v49 }
  0x1c   :  { %571 = vmatpush.msrb.mxu0 %v2064_v36  ;;  %248 = vmatmul.f32.vlgmr.msra.gmra.mxu2 %v3039_v26 }
  0x1d   :  { %323 = vmatpush.msrb.mxu2 %v2026_v28  ;;  %266 = vmatpush.msra.mxu3 %v2149_v51 }
  0x1e   :  { %572 = vmatpush.msrb.mxu0 %v2073_v38  ;;  %591 = vmatpush.msrb.mxu1 %v2142_v49 }
  0x1f   :  { %324 = vmatpush.msrb.mxu2 %v2031_v29  ;;  %267 = vmatpush.msra.mxu3 %v2159_v52 }
  0x20   :  { %573 = vmatpush.msrb.mxu0 %v2081_v39  ;;  %268 = vmatmul.f32.vlgmr.msra.gmra.mxu3 %v3039_v26 }
  0x21   :  { %325 = vmatpush.msrb.mxu2 %v2042_v32  ;;  %343 = vmatpush.msrb.mxu3 %v2099_v43 }
  0x22   :  { %592 = vmatpush.msrb.mxu1 %v2149_v51 }
  0x23   :  { %326 = vmatpush.msrb.mxu2 %v2049_v33  ;;  %344 = vmatpush.msrb.mxu3 %v2104_v44 }
  0x24   :  { %593 = vmatpush.msrb.mxu1 %v2159_v52 }
  0x25   :  { %327 = vmatpush.msrb.mxu2 %v2057_v35  ;;  %345 = vmatpush.msrb.mxu3 %v2112_v45 }
  0x27   :  { %328 = vmatpush.msrb.mxu2 %v2064_v36  ;;  %346 = vmatpush.msrb.mxu3 %v2121_v46 }
  0x29   :  { %329 = vmatpush.msrb.mxu2 %v2073_v38  ;;  %347 = vmatpush.msrb.mxu3 %v2131_v48 }
  0x2b   :  { %330 = vmatpush.msrb.mxu2 %v2081_v39  ;;  %348 = vmatpush.msrb.mxu3 %v2142_v49 }
  0x2d   :  { %404 = vmatpush.msra.mxu2 %v2026_v28  ;;  %349 = vmatpush.msrb.mxu3 %v2149_v51 }
  0x2f   :  { %405 = vmatpush.msra.mxu2 %v2031_v29  ;;  %350 = vmatpush.msrb.mxu3 %v2159_v52 }
  0x31   :  { %406 = vmatpush.msra.mxu2 %v2042_v32  ;;  %424 = vmatpush.msra.mxu3 %v2099_v43 }
  0x33   :  { %407 = vmatpush.msra.mxu2 %v2049_v33  ;;  %425 = vmatpush.msra.mxu3 %v2104_v44 }
  0x35   :  { %408 = vmatpush.msra.mxu2 %v2057_v35  ;;  %426 = vmatpush.msra.mxu3 %v2112_v45 }
  0x37   :  { %409 = vmatpush.msra.mxu2 %v2064_v36  ;;  %427 = vmatpush.msra.mxu3 %v2121_v46 }
  0x39   :  { %410 = vmatpush.msra.mxu2 %v2073_v38  ;;  %428 = vmatpush.msra.mxu3 %v2131_v48 }
  0x3b   :  { %411 = vmatpush.msra.mxu2 %v2081_v39  ;;  %429 = vmatpush.msra.mxu3 %v2142_v49 }
  0x3d   :  { %430 = vmatpush.msra.mxu3 %v2149_v51 }
  0x3f   :  { %431 = vmatpush.msra.mxu3 %v2159_v52 }
  0x5e   :  { %v41_v42 = vpop.permute.xlu2 %40 }
  0x5f   :  { %vm55_vm5 = vcmp.eq.s32.totalorder %v2017_v24, %v41_v42 }
  0x60   :  { %v1717_v47 = vsel %vm55_vm5, 1.0, %v3039_v26 }
  0x66   :  { %v44_v50 = vpop.permute.xlu2 %43 }
  0x67   :  { %vm56_vm6 = vcmp.eq.s32.totalorder %v2017_v24, %v44_v50 }
  0x68   :  { %v1718_v53 = vsel %vm56_vm6, 1.0, %v3039_v26 }
  0x74   :  { %v29_v25 = vpop.permute.xlu0 %28  ;;  %v35_v34 = vpop.permute.xlu1 %34 }
  0x75   :  { %vm51_vm1 = vcmp.eq.s32.totalorder %v2017_v24, %v29_v25  ;;  %vm53_vm3 = vcmp.eq.s32.totalorder %v2017_v24, %v35_v34 }
  0x76   :  { %v1713_v27 = vsel %vm51_vm1, 1.0, %v3039_v26  ;;  %v1715_v37 = vsel %vm53_vm3, 1.0, %v3039_v26  ;;  %vm309_vm1 = vcmask 523520  }
  0x77   :  { %1722 = vmatmul.msk.f32.vlgmr.msra.gmra.mxu0 %vm96_vm0, %v1713_v27  ;;  %1730 = vmatmul.msk.f32.vlgmr.msra.gmra.mxu1 %vm96_vm0, %v1713_v27 }
  0x78   :  { %728 = vmatpush.msra.mxu0 %v2026_v28  ;;  %748 = vmatpush.msra.mxu1 %v2099_v43 }
  0x7a   :  { %729 = vmatpush.msra.mxu0 %v2031_v29  ;;  %749 = vmatpush.msra.mxu1 %v2104_v44 }
  0x7c   :  { %v38_v40 = vpop.permute.xlu1 %37  ;;  %730 = vmatpush.msra.mxu0 %v2042_v32  ;;  %750 = vmatpush.msra.mxu1 %v2112_v45 }
  0x7d   :  { %v32_v30 = vpop.permute.xlu0 %31  ;;  %vm54_vm4 = vcmp.eq.s32.totalorder %v2017_v24, %v38_v40 }
  0x7e   :  { %vm52_vm2 = vcmp.eq.s32.totalorder %v2017_v24, %v32_v30  ;;  %v1716_v41 = vsel %vm54_vm4, 1.0, %v3039_v26  ;;  %731 = vmatpush.msra.mxu0 %v2049_v33  ;;  %751 = vmatpush.msra.mxu1 %v2121_v46 }
  0x7f   :  { %v1714_v31 = vsel %vm52_vm2, 1.0, %v3039_v26 }
  0x80   :  { %1723 = vmatmul.msk.f32.gmra.mxu0 %vm96_vm0, %v1714_v31  ;;  %1731 = vmatmul.msk.f32.gmra.mxu1 %vm96_vm0, %v1714_v31 }
  0x81   :  { %732 = vmatpush.msra.mxu0 %v2057_v35  ;;  %752 = vmatpush.msra.mxu1 %v2131_v48 }
  0x83   :  { %733 = vmatpush.msra.mxu0 %v2064_v36  ;;  %753 = vmatpush.msra.mxu1 %v2142_v49 }
  0x84   :  { %v50_v56 = vpop.permute.xlu1 %49 }
  0x85   :  { %734 = vmatpush.msra.mxu0 %v2073_v38  ;;  %v47_v54 = vpop.permute.xlu0 %46  ;;  %vm58_vm8 = vcmp.eq.s32.totalorder %v2017_v24, %v50_v56  ;;  %754 = vmatpush.msra.mxu1 %v2149_v51 }
  0x86   :  { %vm57_vm7 = vcmp.eq.s32.totalorder %v2017_v24, %v47_v54  ;;  %v1720_v57 = vsel %vm58_vm8, 1.0, %v3039_v26 }
  0x87   :  { %735 = vmatpush.msra.mxu0 %v2081_v39  ;;  %v1719_v55 = vsel %vm57_vm7, 1.0, %v3039_v26  ;;  %755 = vmatpush.msra.mxu1 %v2159_v52 }
  0x88   :  { %1724 = vmatmul.msk.f32.gmra.mxu0 %vm96_vm0, %v1715_v37  ;;  %1732 = vmatmul.msk.f32.gmra.mxu1 %vm96_vm0, %v1715_v37 }
  0x90   :  { %1725 = vmatmul.msk.f32.gmra.mxu0 %vm96_vm0, %v1716_v41  ;;  %1733 = vmatmul.msk.f32.gmra.mxu1 %vm96_vm0, %v1716_v41 }
  0x98   :  { %1726 = vmatmul.msk.f32.gmra.mxu0 %vm96_vm0, %v1717_v47  ;;  %1734 = vmatmul.msk.f32.gmra.mxu1 %vm96_vm0, %v1717_v47 }
  0xa0   :  { %1727 = vmatmul.msk.f32.gmra.mxu0 %vm96_vm0, %v1718_v53  ;;  %1735 = vmatmul.msk.f32.gmra.mxu1 %vm96_vm0, %v1718_v53  ;;  %v1738_v53 = vld [vmem:[%s3037_s1 + $0x100] ss:$8 sm:$0x3] }
  0xa1   :  { %v2301_v60 = vperm.slane %v1738_v53, 0 }
  0xa8   :  { %1728 = vmatmul.msk.f32.gmra.mxu0 %vm96_vm0, %v1719_v55  ;;  %1736 = vmatmul.msk.f32.gmra.mxu1 %vm96_vm0, %v1719_v55 }
  0xb0   :  { %1729 = vmatmul.msk.f32.gmra.mxu0 %vm96_vm0, %v1720_v57  ;;  %1737 = vmatmul.msk.f32.gmra.mxu1 %vm96_vm0, %v1720_v57  ;;  %vm307_vm0 = vcmask 261120  }
  0xf4   :  { %v138_v58 = vpop.f32.mrf.mxu0  ;;  %v179_v59 = vpop.f32.mrf.mxu1 }
  0xfd   :  { %v141_v63 = vpop.f32.mrf.mxu0  ;;  %v182_v0 = vpop.f32.mrf.mxu1 }
  0xfe   :  { %v2216_v1 = vadd.f32 %v141_v63, %v92_v61  ;;  %v2218_v2 = vadd.f32 %v182_v0, %v93_v62  ;;  %v249_v63 = vpop.f32.mrf.mxu2 }
 0x105   :  { %v144_v3 = vpop.f32.mrf.mxu0  ;;  %v185_v4 = vpop.f32.mrf.mxu1 }
 0x106   :  { %v2220_v5 = vadd.f32 %v144_v3, %v92_v61  ;;  %v2222_v6 = vadd.f32 %v185_v4, %v93_v62  ;;  %v250_v4 = vadd.f32 %v249_v63, %v2301_v60  ;;  %v269_v63 = vpop.f32.mrf.mxu3 }
 0x10d   :  { %v147_v7 = vpop.f32.mrf.mxu0  ;;  %v188_v8 = vpop.f32.mrf.mxu1 }
 0x10e   :  { %v2225_v10 = vadd.f32 %v147_v7, %v92_v61  ;;  %v2227_v11 = vadd.f32 %v188_v8, %v93_v62  ;;  %v2304_v7 = vadd.f32 %v138_v58, %v92_v61  ;;  %v2306_v8 = vadd.f32 %v179_v59, %v93_v62 }
 0x115   :  { %v150_v14 = vpop.f32.mrf.mxu0  ;;  %v191_v16 = vpop.f32.mrf.mxu1 }
 0x116   :  { %v2238_v18 = vadd.f32 %v150_v14, %v92_v61  ;;  %v2240_v19 = vadd.f32 %v191_v16, %v93_v62 }
 0x118   :  { %v474_v20 = vsel %vm2230_vm9, %v2227_v11, %v2240_v19  ;;  %v555_v21 = vsel %vm2230_vm9, %v2240_v19, %v2227_v11  ;;  %v473_v22 = vsel %vm2234_vm10, %v2225_v10, %v2238_v18  ;;  %v554_v23 = vsel %vm2234_vm10, %v2238_v18, %v2225_v10 }
 0x11d   :  { %v153_v24 = vpop.f32.mrf.mxu0  ;;  %v194_v25 = vpop.f32.mrf.mxu1 }
 0x11e   :  { %v2258_v27 = vadd.f32 %v153_v24, %v92_v61  ;;  %v2260_v30 = vadd.f32 %v194_v25, %v93_v62 }
 0x120   :  { %v393_v31 = vsel %vm2230_vm9, %v2222_v6, %v2260_v30  ;;  %v636_v34 = vsel %vm2230_vm9, %v2260_v30, %v2222_v6  ;;  %v392_v37 = vsel %vm2234_vm10, %v2220_v5, %v2258_v27  ;;  %v635_v40 = vsel %vm2234_vm10, %v2258_v27, %v2220_v5 }
 0x125   :  { %v156_v41 = vpop.f32.mrf.mxu0  ;;  %v197_v42 = vpop.f32.mrf.mxu1 }
 0x126   :  { %v2278_v47 = vadd.f32 %v156_v41, %v92_v61  ;;  %v2280_v50 = vadd.f32 %v197_v42, %v93_v62  ;;  %v2324_v41 = vperm.slane %v1738_v53, 1 }
 0x128   :  { %v312_v54 = vsel %vm2230_vm9, %v2218_v2, %v2280_v50  ;;  %v311_v56 = vsel %vm2234_vm10, %v2216_v1, %v2278_v47  ;;  %v716_v57 = vsel %vm2234_vm10, %v2278_v47, %v2216_v1  ;;  %v270_v13 = vadd.f32 %v269_v63, %v2324_v41 }
 0x12d   :  { %v159_v0 = vpop.f32.mrf.mxu0  ;;  %v200_v3 = vpop.f32.mrf.mxu1 }
 0x12e   :  { %v2308_v9 = vadd.f32 %v159_v0, %v92_v61  ;;  %v2310_v12 = vadd.f32 %v200_v3, %v93_v62 }
 0x130   :  { %v221_v14 = vsel %vm2234_vm10, %v2304_v7, %v2308_v9  ;;  %v797_v58 = vsel %vm2234_vm10, %v2308_v9, %v2304_v7  ;;  %v222_v53 = vsel %vm2230_vm9, %v2306_v8, %v2310_v12 }
 0x131   :  { %v272_v59 = vadd.f32 %v250_v4, %v221_v14 }
 0x133   :  { %v1739_v61 = vmul.f32 -1.442695, %v272_v59 }
 0x135   :  { %1810 = vpow2.f32 %v1739_v61 }
 0x13b   :  { %v1811_v62 = vpop.eup %1810 }
 0x13c   :  { %v276_v16 = vadd.f32 1.0, %v1811_v62 }
 0x13e   :  { %1812 = vrcp.f32 %v276_v16  ;;  %v288_v0 = vand.u32 2147483648, %v276_v16  ;;  %v286_v26 = vand.u32 2147483647, %v276_v16  ;;  %vm282_vm12 = vweird.f32 %v276_v16 }
 0x140   :  { %v289_v4 = vor.u32 1.1754944e-38, %v288_v0  ;;  %vm287_vm14 = vcmp.eq.f32.partialorder %v286_v26, 8.507059e+37 }
 0x144   :  { %v1813_v24 = vpop.eup %1812 }
 0x145   :  { %v278_v25 = vmul.f32 %v1813_v24, %v276_v16  ;;  %vm283_vm11 = vweird.f32 %v1813_v24 }
 0x146   :  { %vm284_vm13 = vmor %vm282_vm12, %vm283_vm11 }
 0x147   :  { %v279_v42 = vsub.f32 1.0, %v278_v25 }
 0x149   :  { %v280_v3 = vmul.f32 %v1813_v24, %v279_v42 }
 0x14b   :  { %v281_v55 = vadd.f32 %v1813_v24, %v280_v3 }
 0x14d   :  { %v285_v14 = vsel %vm284_vm13, %v1813_v24, %v281_v55 }
 0x14e   :  { %v290_v59 = vsel %vm287_vm14, %v289_v4, %v285_v14 }
 0x14f   :  { %v292_v61 = vmul.f32 %v290_v59, %v270_v13  ;;  %v295_v42 = vsub.f32 1.0, %v290_v59  ;;  %v301_v16 = vmul.f32 0.0, %v290_v59 }
 0x151   :  { %v293_v62 = vadd.f32 %v292_v61, %v222_v53 }
 0x153   :  { %1814 = vtanh.f32 %v293_v62 }
 0x159   :  { %v1815_v25 = vpop.eup %1814 }
 0x15a   :  { %297 = vrot.lane.b32.xlu2 %v1815_v25, %s1934_s3 }
 0x1b4   :  { %v298_v63 = vpop.permute.xlu2 %297 }
 0x1b5   :  { %v300_v3 = vmul.f32 %v298_v63, %v295_v42 }
 0x1b7   :  { %v302_v0 = vadd.f32 %v301_v16, %v300_v3 }
 0x1b9   :  { %304 = vrot.lane.b32.xlu0 %v302_v0, %s1934_s3 }
 0x22b   :  { %v305_v26 = vpop.permute.xlu0 %304 }
 0x22c   :  { %1740 = vmatmul.msk.f32.vlgmr.msrb.gmra.mxu2 %vm228_vm15, %v305_v26  ;;  %1741 = vmatmul.msk.f32.vlgmr.msrb.gmra.mxu3 %vm228_vm15, %v305_v26  ;;  %308 = vst.msk [vmem:[#allocation2] sm:$0xff] %vm307_vm0, %v305_v26 }
 0x22d   :  { %310 = vst.msk [vmem:[#allocation2 + $0x38] sm:$0xff] %vm309_vm1, %v305_v26  ;;  %485 = vmatpush.msrb.mxu2 %v2026_v28  ;;  %505 = vmatpush.msrb.mxu3 %v2099_v43 }
 0x22f   :  { %486 = vmatpush.msrb.mxu2 %v2031_v29  ;;  %506 = vmatpush.msrb.mxu3 %v2104_v44 }
 0x231   :  { %487 = vmatpush.msrb.mxu2 %v2042_v32  ;;  %507 = vmatpush.msrb.mxu3 %v2112_v45 }
 0x233   :  { %488 = vmatpush.msrb.mxu2 %v2049_v33  ;;  %508 = vmatpush.msrb.mxu3 %v2121_v46 }
 0x235   :  { %489 = vmatpush.msrb.mxu2 %v2057_v35  ;;  %509 = vmatpush.msrb.mxu3 %v2131_v48 }
 0x237   :  { %490 = vmatpush.msrb.mxu2 %v2064_v36  ;;  %510 = vmatpush.msrb.mxu3 %v2142_v49 }
 0x239   :  { %491 = vmatpush.msrb.mxu2 %v2073_v38  ;;  %511 = vmatpush.msrb.mxu3 %v2149_v51 }
 0x23b   :  { %492 = vmatpush.msrb.mxu2 %v2081_v39  ;;  %512 = vmatpush.msrb.mxu3 %v2159_v52 }
 0x2af   :  { %v332_v55 = vpop.f32.mrf.mxu2  ;;  %v352_v16 = vpop.f32.mrf.mxu3 }
 0x2b0   :  { %v333_v13 = vadd.f32 %v332_v55, %v2301_v60  ;;  %v353_v55 = vadd.f32 %v352_v16, %v2324_v41 }
 0x2b2   :  { %v355_v24 = vadd.f32 %v333_v13, %v311_v56 }
 0x2b4   :  { %v1742_v4 = vmul.f32 -1.442695, %v355_v24 }
 0x2b6   :  { %1816 = vpow2.f32 %v1742_v4 }
 0x2bc   :  { %v1817_v14 = vpop.eup %1816 }
 0x2bd   :  { %v359_v59 = vadd.f32 1.0, %v1817_v14 }
 0x2bf   :  { %1818 = vrcp.f32 %v359_v59  ;;  %v371_v25 = vand.u32 2147483648, %v359_v59  ;;  %v369_v63 = vand.u32 2147483647, %v359_v59  ;;  %vm365_vm3 = vweird.f32 %v359_v59 }
 0x2c1   :  { %v372_v26 = vor.u32 1.1754944e-38, %v371_v25  ;;  %vm370_vm5 = vcmp.eq.f32.partialorder %v369_v63, 8.507059e+37 }
 0x2c5   :  { %v1819_v61 = vpop.eup %1818 }
 0x2c6   :  { %v361_v53 = vmul.f32 %v1819_v61, %v359_v59  ;;  %vm366_vm2 = vweird.f32 %v1819_v61 }
 0x2c7   :  { %vm367_vm4 = vmor %vm365_vm3, %vm366_vm2 }
 0x2c8   :  { %v362_v62 = vsub.f32 1.0, %v361_v53 }
 0x2ca   :  { %v363_v42 = vmul.f32 %v1819_v61, %v362_v62 }
 0x2cc   :  { %v364_v3 = vadd.f32 %v1819_v61, %v363_v42 }
 0x2ce   :  { %v368_v56 = vsel %vm367_vm4, %v1819_v61, %v364_v3 }
 0x2cf   :  { %v373_v13 = vsel %vm370_vm5, %v372_v26, %v368_v56 }
 0x2d0   :  { %v375_v24 = vmul.f32 %v373_v13, %v353_v55  ;;  %v378_v53 = vsub.f32 1.0, %v373_v13  ;;  %v384_v62 = vmul.f32 %v373_v13, %v302_v0 }
 0x2d2   :  { %v376_v4 = vadd.f32 %v375_v24, %v312_v54 }
 0x2d4   :  { %1820 = vtanh.f32 %v376_v4 }
 0x2da   :  { %v1821_v14 = vpop.eup %1820 }
 0x2db   :  { %380 = vrot.lane.b32.xlu1 %v1821_v14, %s1934_s3 }
 0x34d   :  { %v381_v59 = vpop.permute.xlu1 %380 }
 0x34e   :  { %v383_v25 = vmul.f32 %v381_v59, %v378_v53 }
 0x350   :  { %v385_v42 = vadd.f32 %v384_v62, %v383_v25 }
 0x352   :  { %387 = vrot.lane.b32.xlu2 %v385_v42, %s1934_s3 }
 0x3ac   :  { %v388_v61 = vpop.permute.xlu2 %387 }
 0x3ad   :  { %390 = vst.msk [vmem:[#allocation2 + $0x8] sm:$0xff] %vm307_vm0, %v388_v61  ;;  %1743 = vmatmul.msk.f32.vlgmr.msra.gmra.mxu2 %vm228_vm15, %v388_v61  ;;  %1744 = vmatmul.msk.f32.vlgmr.msra.gmra.mxu3 %vm228_vm15, %v388_v61 }
 0x3ae   :  { %391 = vst.msk [vmem:[#allocation2 + $0x30] sm:$0xff] %vm309_vm1, %v388_v61  ;;  %647 = vmatpush.msra.mxu2 %v2026_v28  ;;  %667 = vmatpush.msra.mxu3 %v2099_v43 }
 0x3b0   :  { %648 = vmatpush.msra.mxu2 %v2031_v29  ;;  %668 = vmatpush.msra.mxu3 %v2104_v44 }
 0x3b2   :  { %649 = vmatpush.msra.mxu2 %v2042_v32  ;;  %669 = vmatpush.msra.mxu3 %v2112_v45 }
 0x3b4   :  { %650 = vmatpush.msra.mxu2 %v2049_v33  ;;  %670 = vmatpush.msra.mxu3 %v2121_v46 }
 0x3b6   :  { %651 = vmatpush.msra.mxu2 %v2057_v35  ;;  %671 = vmatpush.msra.mxu3 %v2131_v48 }
 0x3b8   :  { %652 = vmatpush.msra.mxu2 %v2064_v36  ;;  %672 = vmatpush.msra.mxu3 %v2142_v49 }
 0x3ba   :  { %653 = vmatpush.msra.mxu2 %v2073_v38  ;;  %673 = vmatpush.msra.mxu3 %v2149_v51 }
 0x3bc   :  { %654 = vmatpush.msra.mxu2 %v2081_v39  ;;  %674 = vmatpush.msra.mxu3 %v2159_v52 }
 0x430   :  { %v413_v54 = vpop.f32.mrf.mxu2  ;;  %v433_v53 = vpop.f32.mrf.mxu3 }
 0x431   :  { %v414_v0 = vadd.f32 %v413_v54, %v2301_v60  ;;  %v434_v25 = vadd.f32 %v433_v53, %v2324_v41 }
 0x433   :  { %v436_v63 = vadd.f32 %v414_v0, %v392_v37 }
 0x435   :  { %v1745_v16 = vmul.f32 -1.442695, %v436_v63 }
 0x437   :  { %1822 = vpow2.f32 %v1745_v16 }
 0x43d   :  { %v1823_v3 = vpop.eup %1822 }
 0x43e   :  { %v440_v26 = vadd.f32 1.0, %v1823_v3 }
 0x440   :  { %1824 = vrcp.f32 %v440_v26  ;;  %v452_v24 = vand.u32 2147483648, %v440_v26  ;;  %v450_v14 = vand.u32 2147483647, %v440_v26  ;;  %vm446_vm7 = vweird.f32 %v440_v26 }
 0x442   :  { %v453_v62 = vor.u32 1.1754944e-38, %v452_v24  ;;  %vm451_vm11 = vcmp.eq.f32.partialorder %v450_v14, 8.507059e+37 }
 0x446   :  { %v1825_v55 = vpop.eup %1824 }
 0x447   :  { %v442_v56 = vmul.f32 %v1825_v55, %v440_v26  ;;  %vm447_vm6 = vweird.f32 %v1825_v55 }
 0x448   :  { %vm448_vm8 = vmor %vm446_vm7, %vm447_vm6 }
 0x449   :  { %v443_v13 = vsub.f32 1.0, %v442_v56 }
 0x44b   :  { %v444_v4 = vmul.f32 %v1825_v55, %v443_v13 }
 0x44d   :  { %v445_v59 = vadd.f32 %v1825_v55, %v444_v4 }
 0x44f   :  { %v449_v37 = vsel %vm448_vm8, %v1825_v55, %v445_v59 }
 0x450   :  { %v454_v61 = vsel %vm451_vm11, %v453_v62, %v449_v37 }
 0x451   :  { %v456_v54 = vmul.f32 %v454_v61, %v434_v25  ;;  %v459_v16 = vsub.f32 1.0, %v454_v61  ;;  %v465_v26 = vmul.f32 %v454_v61, %v385_v42 }
 0x453   :  { %v457_v0 = vadd.f32 %v456_v54, %v393_v31 }
 0x455   :  { %1826 = vtanh.f32 %v457_v0 }
 0x45b   :  { %v1827_v63 = vpop.eup %1826 }
 0x45c   :  { %461 = vrot.lane.b32.xlu0 %v1827_v63, %s1934_s3 }
 0x4ce   :  { %v462_v3 = vpop.permute.xlu0 %461 }
 0x4cf   :  { %v464_v56 = vmul.f32 %v462_v3, %v459_v16 }
 0x4d1   :  { %v466_v13 = vadd.f32 %v465_v26, %v464_v56 }
 0x4d3   :  { %468 = vrot.lane.b32.xlu1 %v466_v13, %s1934_s3 }
 0x545   :  { %v469_v55 = vpop.permute.xlu1 %468 }
 0x546   :  { %471 = vst.msk [vmem:[#allocation2 + $0x10] sm:$0xff] %vm307_vm0, %v469_v55  ;;  %1746 = vmatmul.msk.f32.vlgmr.msrb.gmra.mxu2 %vm228_vm15, %v469_v55  ;;  %1747 = vmatmul.msk.f32.vlgmr.msrb.gmra.mxu3 %vm228_vm15, %v469_v55 }
 0x547   :  { %472 = vst.msk [vmem:[#allocation2 + $0x28] sm:$0xff] %vm309_vm1, %v469_v55  ;;  %809 = vmatpush.msrb.mxu2 %v2026_v28  ;;  %829 = vmatpush.msrb.mxu3 %v2099_v43 }
 0x549   :  { %810 = vmatpush.msrb.mxu2 %v2031_v29  ;;  %830 = vmatpush.msrb.mxu3 %v2104_v44 }
 0x54b   :  { %811 = vmatpush.msrb.mxu2 %v2042_v32  ;;  %831 = vmatpush.msrb.mxu3 %v2112_v45 }
 0x54d   :  { %812 = vmatpush.msrb.mxu2 %v2049_v33  ;;  %832 = vmatpush.msrb.mxu3 %v2121_v46 }
 0x54f   :  { %813 = vmatpush.msrb.mxu2 %v2057_v35  ;;  %833 = vmatpush.msrb.mxu3 %v2131_v48 }
 0x551   :  { %814 = vmatpush.msrb.mxu2 %v2064_v36  ;;  %834 = vmatpush.msrb.mxu3 %v2142_v49 }
 0x553   :  { %815 = vmatpush.msrb.mxu2 %v2073_v38  ;;  %835 = vmatpush.msrb.mxu3 %v2149_v51 }
 0x555   :  { %816 = vmatpush.msrb.mxu2 %v2081_v39  ;;  %836 = vmatpush.msrb.mxu3 %v2159_v52 }
 0x5c9   :  { %v494_v28 = vpop.f32.mrf.mxu2  ;;  %v514_v48 = vpop.f32.mrf.mxu3 }
 0x5ca   :  { %v495_v29 = vadd.f32 %v494_v28, %v2301_v60  ;;  %v515_v52 = vadd.f32 %v514_v48, %v2324_v41 }
 0x5cc   :  { %v517_v32 = vadd.f32 %v495_v29, %v473_v22 }
 0x5ce   :  { %v1748_v33 = vmul.f32 -1.442695, %v517_v32 }
 0x5d0   :  { %1828 = vpow2.f32 %v1748_v33 }
 0x5d6   :  { %v1829_v35 = vpop.eup %1828 }
 0x5d7   :  { %v521_v36 = vadd.f32 1.0, %v1829_v35 }
 0x5d9   :  { %1830 = vrcp.f32 %v521_v36  ;;  %v533_v39 = vand.u32 2147483648, %v521_v36  ;;  %v531_v46 = vand.u32 2147483647, %v521_v36  ;;  %vm527_vm13 = vweird.f32 %v521_v36 }
 0x5db   :  { %v534_v51 = vor.u32 1.1754944e-38, %v533_v39  ;;  %vm532_vm2 = vcmp.eq.f32.partialorder %v531_v46, 8.507059e+37 }
 0x5df   :  { %v1831_v38 = vpop.eup %1830 }
 0x5e0   :  { %v523_v43 = vmul.f32 %v1831_v38, %v521_v36  ;;  %vm528_vm12 = vweird.f32 %v1831_v38 }
 0x5e1   :  { %vm529_vm14 = vmor %vm527_vm13, %vm528_vm12 }
 0x5e2   :  { %v524_v44 = vsub.f32 1.0, %v523_v43 }
 0x5e4   :  { %v525_v45 = vmul.f32 %v1831_v38, %v524_v44 }
 0x5e6   :  { %v526_v49 = vadd.f32 %v1831_v38, %v525_v45 }
 0x5e8   :  { %v530_v22 = vsel %vm529_vm14, %v1831_v38, %v526_v49 }
 0x5e9   :  { %v535_v31 = vsel %vm532_vm2, %v534_v51, %v530_v22 }
 0x5ea   :  { %v537_v42 = vmul.f32 %v535_v31, %v515_v52  ;;  %v540_v14 = vsub.f32 1.0, %v535_v31  ;;  %v546_v59 = vmul.f32 %v535_v31, %v466_v13 }
 0x5ec   :  { %v538_v24 = vadd.f32 %v537_v42, %v474_v20 }
 0x5ee   :  { %1832 = vtanh.f32 %v538_v24 }
 0x5f4   :  { %v1833_v4 = vpop.eup %1832 }
 0x5f5   :  { %542 = vrot.lane.b32.xlu2 %v1833_v4, %s1934_s3 }
 0x64f   :  { %v543_v53 = vpop.permute.xlu2 %542 }
 0x650   :  { %v545_v62 = vmul.f32 %v543_v53, %v540_v14 }
 0x652   :  { %v547_v25 = vadd.f32 %v546_v59, %v545_v62 }
 0x654   :  { %549 = vrot.lane.b32.xlu0 %v547_v25, %s1934_s3 }
 0x6c6   :  { %v550_v37 = vpop.permute.xlu0 %549 }
 0x6c7   :  { %552 = vst.msk [vmem:[#allocation2 + $0x18] sm:$0xff] %vm307_vm0, %v550_v37  ;;  %1749 = vmatmul.msk.f32.vlgmr.msrb.gmra.mxu0 %vm228_vm15, %v550_v37  ;;  %1750 = vmatmul.msk.f32.vlgmr.msrb.gmra.mxu1 %vm228_vm15, %v550_v37 }
 0x6c8   :  { %553 = vst.msk [vmem:[#allocation2 + $0x20] sm:$0xff] %vm309_vm1, %v550_v37 }
 0x744   :  { %v575_v20 = vpop.f32.mrf.mxu0  ;;  %v595_v29 = vpop.f32.mrf.mxu1 }
 0x745   :  { %v576_v61 = vadd.f32 %v575_v20, %v2301_v60  ;;  %v596_v10 = vadd.f32 %v595_v29, %v2324_v41 }
 0x747   :  { %v598_v54 = vadd.f32 %v576_v61, %v554_v23 }
 0x749   :  { %v1751_v0 = vmul.f32 -1.442695, %v598_v54 }
 0x74b   :  { %1834 = vpow2.f32 %v1751_v0 }
 0x751   :  { %v1835_v63 = vpop.eup %1834 }
 0x752   :  { %v602_v16 = vadd.f32 1.0, %v1835_v63 }
 0x754   :  { %1836 = vrcp.f32 %v602_v16  ;;  %v614_v13 = vand.u32 2147483648, %v602_v16  ;;  %v612_v28 = vand.u32 2147483647, %v602_v16  ;;  %vm608_vm4 = vweird.f32 %v602_v16 }
 0x756   :  { %v615_v33 = vor.u32 1.1754944e-38, %v614_v13  ;;  %vm613_vm6 = vcmp.eq.f32.partialorder %v612_v28, 8.507059e+37 }
 0x75a   :  { %v1837_v3 = vpop.eup %1836 }
 0x75b   :  { %v604_v26 = vmul.f32 %v1837_v3, %v602_v16  ;;  %vm609_vm3 = vweird.f32 %v1837_v3 }
 0x75c   :  { %vm610_vm5 = vmor %vm608_vm4, %vm609_vm3 }
 0x75d   :  { %v605_v56 = vsub.f32 1.0, %v604_v26 }
 0x75f   :  { %v606_v55 = vmul.f32 %v1837_v3, %v605_v56 }
 0x761   :  { %v607_v32 = vadd.f32 %v1837_v3, %v606_v55 }
 0x763   :  { %v611_v18 = vsel %vm610_vm5, %v1837_v3, %v607_v32 }
 0x764   :  { %v616_v23 = vsel %vm613_vm6, %v615_v33, %v611_v18 }
 0x765   :  { %v618_v35 = vmul.f32 %v616_v23, %v596_v10  ;;  %v621_v43 = vsub.f32 1.0, %v616_v23  ;;  %v627_v39 = vmul.f32 %v616_v23, %v547_v25 }
 0x767   :  { %v619_v36 = vadd.f32 %v618_v35, %v555_v21 }
 0x769   :  { %1838 = vtanh.f32 %v619_v36 }
 0x76f   :  { %v1839_v38 = vpop.eup %1838 }
 0x770   :  { %623 = vrot.lane.b32.xlu1 %v1839_v38, %s1934_s3  ;;  %v3045_v38 = vsel %vm2230_vm9, %v2280_v50, %v2218_v2 }
 0x7e2   :  { %v624_v44 = vpop.permute.xlu1 %623 }
 0x7e3   :  { %v626_v45 = vmul.f32 %v624_v44, %v621_v43 }
 0x7e5   :  { %v628_v46 = vadd.f32 %v627_v39, %v626_v45 }
 0x7e7   :  { %630 = vrot.lane.b32.xlu2 %v628_v46, %s1934_s3 }
 0x841   :  { %v631_v48 = vpop.permute.xlu2 %630 }
 0x842   :  { %633 = vst.msk [vmem:[#allocation2 + $0x20] sm:$0xff] %vm307_vm0, %v631_v48  ;;  %1752 = vmatmul.msk.f32.vlgmr.msra.gmra.mxu2 %vm228_vm15, %v631_v48  ;;  %1753 = vmatmul.msk.f32.vlgmr.msra.gmra.mxu3 %vm228_vm15, %v631_v48 }
 0x843   :  { %634 = vst.msk [vmem:[#allocation2 + $0x18] sm:$0xff] %vm309_vm1, %v631_v48 }
 0x8c5   :  { %v656_v11 = vpop.f32.mrf.mxu2  ;;  %v676_v53 = vpop.f32.mrf.mxu3 }
 0x8c6   :  { %v657_v19 = vadd.f32 %v656_v11, %v2301_v60  ;;  %v677_v5 = vadd.f32 %v676_v53, %v2324_v41 }
 0x8c8   :  { %v679_v21 = vadd.f32 %v657_v19, %v635_v40 }
 0x8ca   :  { %v1754_v49 = vmul.f32 -1.442695, %v679_v21 }
 0x8cc   :  { %1840 = vpow2.f32 %v1754_v49 }
 0x8d2   :  { %v1841_v51 = vpop.eup %1840 }
 0x8d3   :  { %v683_v52 = vadd.f32 1.0, %v1841_v51 }
 0x8d5   :  { %1842 = vrcp.f32 %v683_v52  ;;  %v695_v24 = vand.u32 2147483648, %v683_v52  ;;  %v693_v14 = vand.u32 2147483647, %v683_v52  ;;  %vm689_vm8 = vweird.f32 %v683_v52 }
 0x8d7   :  { %v696_v62 = vor.u32 1.1754944e-38, %v695_v24  ;;  %vm694_vm12 = vcmp.eq.f32.partialorder %v693_v14, 8.507059e+37 }
 0x8db   :  { %v1843_v22 = vpop.eup %1842 }
 0x8dc   :  { %v685_v31 = vmul.f32 %v1843_v22, %v683_v52  ;;  %vm690_vm7 = vweird.f32 %v1843_v22 }
 0x8dd   :  { %vm691_vm11 = vmor %vm689_vm8, %vm690_vm7 }
 0x8de   :  { %v686_v42 = vsub.f32 1.0, %v685_v31 }
 0x8e0   :  { %v687_v4 = vmul.f32 %v1843_v22, %v686_v42 }
 0x8e2   :  { %v688_v59 = vadd.f32 %v1843_v22, %v687_v4 }
 0x8e4   :  { %v692_v27 = vsel %vm691_vm11, %v1843_v22, %v688_v59 }
 0x8e5   :  { %v697_v40 = vsel %vm694_vm12, %v696_v62, %v692_v27 }
 0x8e6   :  { %v699_v25 = vmul.f32 %v697_v40, %v677_v5  ;;  %v702_v61 = vsub.f32 1.0, %v697_v40  ;;  %v708_v0 = vmul.f32 %v697_v40, %v628_v46  ;;  %v3046_v5 = vsel %vm2230_vm9, %v2310_v12, %v2306_v8  ;;  %v899_v8 = vld [vmem:[%s3037_s1 + $0x178] sm:$0xff]  ;;  %v896_v12 = vld [vmem:[%s3037_s1 + $0x160] sm:$0xff] }
 0x8e8   :  { %v700_v37 = vadd.f32 %v699_v25, %v636_v34  ;;  %v900_v25 = vld [vmem:[%s3037_s1 + $0x180] sm:$0xff] }
 0x8e9   :  { %941 = vmatpush.msrb.mxu0 %v900_v25 }
 0x8ea   :  { %1844 = vtanh.f32 %v700_v37  ;;  %v898_v37 = vld [vmem:[%s3037_s1 + $0x170] sm:$0xff] }
 0x8eb   :  { %942 = vmatpush.msrb.mxu0 %v898_v37 }
 0x8ed   :  { %943 = vmatpush.msrb.mxu0 %v896_v12 }
 0x8f0   :  { %v1845_v20 = vpop.eup %1844 }
 0x8f1   :  { %704 = vrot.lane.b32.xlu0 %v1845_v20, %s1934_s3  ;;  %v897_v20 = vld [vmem:[%s3037_s1 + $0x168] sm:$0xff] }
 0x963   :  { %v705_v54 = vpop.permute.xlu0 %704 }
 0x964   :  { %v707_v63 = vmul.f32 %v705_v54, %v702_v61  ;;  %v894_v61 = vld [vmem:[%s3037_s1 + $0x150] sm:$0xff]  ;;  %v895_v54 = vld [vmem:[%s3037_s1 + $0x158] sm:$0xff] }
 0x965   :  { %944 = vmatpush.msrb.mxu0 %v894_v61 }
 0x966   :  { %v709_v16 = vadd.f32 %v708_v0, %v707_v63 }
 0x968   :  { %711 = vrot.lane.b32.xlu1 %v709_v16, %s1934_s3 }
 0x9da   :  { %v712_v3 = vpop.permute.xlu1 %711 }
 0x9db   :  { %714 = vst.msk [vmem:[#allocation2 + $0x28] sm:$0xff] %vm307_vm0, %v712_v3  ;;  %1755 = vmatmul.msk.f32.vlgmr.msra.gmra.mxu0 %vm228_vm15, %v712_v3  ;;  %1756 = vmatmul.msk.f32.vlgmr.msra.gmra.mxu1 %vm228_vm15, %v712_v3 }
 0x9dc   :  { %715 = vst.msk [vmem:[#allocation2 + $0x10] sm:$0xff] %vm309_vm1, %v712_v3 }
 0xa58   :  { %v737_v6 = vpop.f32.mrf.mxu0  ;;  %v757_v18 = vpop.f32.mrf.mxu1 }
 0xa59   :  { %v738_v30 = vadd.f32 %v737_v6, %v2301_v60  ;;  %v758_v1 = vadd.f32 %v757_v18, %v2324_v41  ;;  %v2567_v18 = vld [vmem:[%s3037_s1 + $0x200] sm:$0xff] }
 0xa5b   :  { %v760_v34 = vadd.f32 %v738_v30, %v716_v57  ;;  %v892_v30 = vld [vmem:[%s3037_s1 + $0x140] sm:$0xff] }
 0xa5c   :  { %945 = vmatpush.msrb.mxu0 %v892_v30 }
 0xa5d   :  { %v1757_v26 = vmul.f32 -1.442695, %v760_v34  ;;  %v893_v34 = vld [vmem:[%s3037_s1 + $0x148] sm:$0xff] }
 0xa5f   :  { %1846 = vpow2.f32 %v1757_v26  ;;  %v890_v26 = vld [vmem:[%s3037_s1 + $0x130] sm:$0xff] }
 0xa60   :  { %946 = vmatpush.msrb.mxu0 %v890_v26 }
 0xa65   :  { %v1847_v56 = vpop.eup %1846 }
 0xa66   :  { %v764_v13 = vadd.f32 1.0, %v1847_v56  ;;  %v891_v56 = vld [vmem:[%s3037_s1 + $0x138] sm:$0xff] }
 0xa68   :  { %1848 = vrcp.f32 %v764_v13  ;;  %v776_v32 = vand.u32 2147483648, %v764_v13  ;;  %v774_v10 = vand.u32 2147483647, %v764_v13  ;;  %vm770_vm14 = vweird.f32 %v764_v13 }
 0xa6a   :  { %v777_v35 = vor.u32 1.1754944e-38, %v776_v32  ;;  %vm775_vm3 = vcmp.eq.f32.partialorder %v774_v10, 8.507059e+37  ;;  %v2562_v10 = vld [vmem:[%s3037_s1 + $0x210] sm:$0xff] }
 0xa6b   :  { %1048 = vmatpush.msra.mxu2 %v2562_v10 }
 0xa6d   :  { %1049 = vmatpush.msra.mxu2 %v2567_v18 }
 0xa6e   :  { %v1849_v55 = vpop.eup %1848 }
 0xa6f   :  { %v766_v28 = vmul.f32 %v1849_v55, %v764_v13  ;;  %vm771_vm13 = vweird.f32 %v1849_v55  ;;  %v888_v13 = vld [vmem:[%s3037_s1 + $0x120] sm:$0xff] }
 0xa70   :  { %vm772_vm2 = vmor %vm770_vm14, %vm771_vm13  ;;  %947 = vmatpush.msrb.mxu0 %v888_v13 }
 0xa71   :  { %v767_v29 = vsub.f32 1.0, %v766_v28  ;;  %v886_v28 = vld [vmem:[%s3037_s1 + $0x110] sm:$0xff] }
 0xa72   :  { %948 = vmatpush.msrb.mxu0 %v886_v28 }
 0xa73   :  { %v768_v33 = vmul.f32 %v1849_v55, %v767_v29  ;;  %v887_v29 = vld [vmem:[%s3037_s1 + $0x118] sm:$0xff] }
 0xa74   :  { %1360 = vmatpush.msra.mxu0 %v2562_v10 }
 0xa75   :  { %v769_v23 = vadd.f32 %v1849_v55, %v768_v33 }
 0xa76   :  { %1361 = vmatpush.msra.mxu0 %v2567_v18 }
 0xa77   :  { %v773_v47 = vsel %vm772_vm2, %v1849_v55, %v769_v23  ;;  %v889_v55 = vld [vmem:[%s3037_s1 + $0x128] sm:$0xff] }
 0xa78   :  { %v778_v57 = vsel %vm775_vm3, %v777_v35, %v773_v47  ;;  %v2576_v35 = vld [vmem:[%s3037_s1 + $0x1f0] sm:$0xff] }
 0xa79   :  { %v780_v36 = vmul.f32 %v778_v57, %v758_v1  ;;  %v783_v39 = vsub.f32 1.0, %v778_v57  ;;  %v789_v46 = vmul.f32 %v778_v57, %v709_v16  ;;  %v2583_v1 = vld [vmem:[%s3037_s1 + $0x1e0] sm:$0xff]  ;;  %1050 = vmatpush.msra.mxu2 %v2576_v35  ;;  %1362 = vmatpush.msra.mxu0 %v2576_v35  ;;  %v2590_v47 = vld [vmem:[%s3037_s1 + $0x1d0] sm:$0xff] }
 0xa7a   :  { %v2597_v57 = vld [vmem:[%s3037_s1 + $0x1c0] sm:$0xff] }
 0xa7b   :  { %v781_v43 = vadd.f32 %v780_v36, %v3045_v38  ;;  %1051 = vmatpush.msra.mxu2 %v2583_v1  ;;  %1363 = vmatpush.msra.mxu0 %v2583_v1  ;;  %v880_v36 = vld [vmem:[#allocation2 + $0x10] sm:$0xff] }
 0xa7c   :  { %v2605_v38 = vld [vmem:[%s3037_s1 + $0x1b0] sm:$0xff] }
 0xa7d   :  { %1850 = vtanh.f32 %v781_v43  ;;  %1052 = vmatpush.msra.mxu2 %v2590_v47  ;;  %1364 = vmatpush.msra.mxu0 %v2590_v47  ;;  %v2613_v43 = vld [vmem:[%s3037_s1 + $0x1a0] sm:$0xff] }
 0xa7f   :  { %1053 = vmatpush.msra.mxu2 %v2597_v57  ;;  %1365 = vmatpush.msra.mxu0 %v2597_v57 }
 0xa81   :  { %1054 = vmatpush.msra.mxu2 %v2605_v38  ;;  %1366 = vmatpush.msra.mxu0 %v2605_v38 }
 0xa83   :  { %v1851_v44 = vpop.eup %1850  ;;  %1055 = vmatpush.msra.mxu2 %v2613_v43  ;;  %1367 = vmatpush.msra.mxu0 %v2613_v43 }
 0xa84   :  { %785 = vrot.lane.b32.xlu2 %v1851_v44, %s1934_s3  ;;  %v3047_v44 = vmov 0.0  }
 0xade   :  { %v786_v45 = vpop.permute.xlu2 %785 }
 0xadf   :  { %v788_v48 = vmul.f32 %v786_v45, %v783_v39  ;;  %v881_v39 = vld [vmem:[#allocation2 + $0x18] sm:$0xff] }
 0xae0   :  { %v2629_v45 = vld [vmem:[%s3037_s1 + $0x218] sm:$0xff] }
 0xae1   :  { %v790_v11 = vadd.f32 %v789_v46, %v788_v48  ;;  %v2634_v46 = vld [vmem:[%s3037_s1 + $0x208] sm:$0xff]  ;;  %1068 = vmatpush.msra.mxu3 %v2629_v45  ;;  %v2641_v48 = vld [vmem:[%s3037_s1 + $0x1f8] sm:$0xff] }
 0xae3   :  { %792 = vrot.lane.b32.xlu0 %v790_v11, %s1934_s3  ;;  %1069 = vmatpush.msra.mxu3 %v2634_v46 }
 0xae5   :  { %1070 = vmatpush.msra.mxu3 %v2641_v48 }
 0xb55   :  { %v793_v19 = vpop.permute.xlu0 %792 }
 0xb56   :  { %795 = vst.msk [vmem:[#allocation2 + $0x30] sm:$0xff] %vm307_vm0, %v793_v19  ;;  %1758 = vmatmul.msk.f32.vlgmr.msrb.gmra.mxu2 %vm228_vm15, %v793_v19  ;;  %1759 = vmatmul.msk.f32.vlgmr.msrb.gmra.mxu3 %vm228_vm15, %v793_v19 }
 0xb57   :  { %796 = vst.msk [vmem:[#allocation2 + $0x8] sm:$0xff] %vm309_vm1, %v793_v19  ;;  %1126 = vmatpush.msrb.mxu2 %v2562_v10  ;;  %v2659_v19 = vld [vmem:[%s3037_s1 + $0x1d8] sm:$0xff] }
 0xb59   :  { %1127 = vmatpush.msrb.mxu2 %v2567_v18 }
 0xb5b   :  { %1128 = vmatpush.msrb.mxu2 %v2576_v35 }
 0xb5d   :  { %1129 = vmatpush.msrb.mxu2 %v2583_v1 }
 0xb5e   :  { %v879_v23 = vld [vmem:[#allocation2 + $0x8] sm:$0xff]  ;;  %1056 = vmatmul.f32.vlgmr.msra.gmra.mxu2 %v3047_v44 }
 0xb5f   :  { %1130 = vmatpush.msrb.mxu2 %v2590_v47 }
 0xb61   :  { %1131 = vmatpush.msrb.mxu2 %v2597_v57 }
 0xb63   :  { %1132 = vmatpush.msrb.mxu2 %v2605_v38 }
 0xb65   :  { %1133 = vmatpush.msrb.mxu2 %v2613_v43 }
 0xb67   :  { %1204 = vmatpush.msra.mxu2 %v2562_v10 }
 0xb69   :  { %1205 = vmatpush.msra.mxu2 %v2567_v18 }
 0xb6b   :  { %1206 = vmatpush.msra.mxu2 %v2576_v35 }
 0xb6d   :  { %1207 = vmatpush.msra.mxu2 %v2583_v1 }
 0xb6f   :  { %1208 = vmatpush.msra.mxu2 %v2590_v47 }
 0xb71   :  { %1209 = vmatpush.msra.mxu2 %v2597_v57 }
 0xb73   :  { %1210 = vmatpush.msra.mxu2 %v2605_v38 }
 0xb75   :  { %1211 = vmatpush.msra.mxu2 %v2613_v43 }
 0xbd9   :  { %v818_v2 = vpop.f32.mrf.mxu2  ;;  %v838_v53 = vpop.f32.mrf.mxu3 }
 0xbda   :  { %v819_v50 = vadd.f32 %v818_v2, %v2301_v60  ;;  %v839_v7 = vadd.f32 %v838_v53, %v2324_v41  ;;  %v901_v41 = vld [vmem:[%s3037_s1 + $0x188] sm:$0xff]  ;;  %v882_v2 = vld [vmem:[#allocation2 + $0x20] sm:$0xff] }
 0xbdb   :  { %982 = vmatpush.msrb.mxu1 %v901_v41 }
 0xbdc   :  { %v841_v21 = vadd.f32 %v819_v50, %v797_v58  ;;  %v2670_v50 = vld [vmem:[%s3037_s1 + $0x1c8] sm:$0xff] }
 0xbdd   :  { %983 = vmatpush.msrb.mxu1 %v899_v8 }
 0xbde   :  { %v1760_v49 = vmul.f32 -1.442695, %v841_v21  ;;  %v2677_v21 = vld [vmem:[%s3037_s1 + $0x1b8] sm:$0xff] }
 0xbdf   :  { %984 = vmatpush.msrb.mxu1 %v897_v20 }
 0xbe0   :  { %1852 = vpow2.f32 %v1760_v49  ;;  %v2686_v49 = vld [vmem:[%s3037_s1 + $0x1a8] sm:$0xff] }
 0xbe1   :  { %985 = vmatpush.msrb.mxu1 %v895_v54 }
 0xbe3   :  { %986 = vmatpush.msrb.mxu1 %v893_v34 }
 0xbe5   :  { %987 = vmatpush.msrb.mxu1 %v891_v56 }
 0xbe6   :  { %v1853_v51 = vpop.eup %1852 }
 0xbe7   :  { %v845_v52 = vadd.f32 1.0, %v1853_v51  ;;  %988 = vmatpush.msrb.mxu1 %v889_v55  ;;  %v883_v51 = vld [vmem:[#allocation2 + $0x28] sm:$0xff] }
 0xbe9   :  { %1854 = vrcp.f32 %v845_v52  ;;  %v857_v24 = vand.u32 2147483648, %v845_v52  ;;  %v855_v14 = vand.u32 2147483647, %v845_v52  ;;  %vm851_vm5 = vweird.f32 %v845_v52  ;;  %989 = vmatpush.msrb.mxu1 %v887_v29 }
 0xbeb   :  { %v858_v59 = vor.u32 1.1754944e-38, %v857_v24  ;;  %vm856_vm7 = vcmp.eq.f32.partialorder %v855_v14, 8.507059e+37  ;;  %1380 = vmatpush.msra.mxu1 %v2629_v45  ;;  %v1761_v24 = vld [vmem:[%s3037_s1 + $0x190] ss:$8 sm:$0x3] }
 0xbec   :  { %v906_v14 = vperm.slane %v1761_v24, 1 }
 0xbed   :  { %1381 = vmatpush.msra.mxu1 %v2634_v46 }
 0xbef   :  { %v1855_v22 = vpop.eup %1854  ;;  %1382 = vmatpush.msra.mxu1 %v2641_v48 }
 0xbf0   :  { %v847_v31 = vmul.f32 %v1855_v22, %v845_v52  ;;  %vm852_vm4 = vweird.f32 %v1855_v22  ;;  %v884_v52 = vld [vmem:[#allocation2 + $0x30] sm:$0xff] }
 0xbf1   :  { %vm853_vm6 = vmor %vm851_vm5, %vm852_vm4 }
 0xbf2   :  { %v848_v42 = vsub.f32 1.0, %v847_v31 }
 0xbf4   :  { %v849_v4 = vmul.f32 %v1855_v22, %v848_v42 }
 0xbf6   :  { %v850_v60 = vadd.f32 %v1855_v22, %v849_v4  ;;  %v905_v4 = vperm.slane %v1761_v24, 0 }
 0xbf8   :  { %v854_v9 = vsel %vm853_vm6, %v1855_v22, %v850_v60 }
 0xbf9   :  { %v859_v58 = vsel %vm856_vm7, %v858_v59, %v854_v9 }
 0xbfa   :  { %v861_v62 = vmul.f32 %v859_v58, %v839_v7  ;;  %v864_v0 = vsub.f32 1.0, %v859_v58  ;;  %v870_v16 = vmul.f32 %v859_v58, %v790_v11  ;;  %v2650_v11 = vld [vmem:[%s3037_s1 + $0x1e8] sm:$0xff] }
 0xbfb   :  { %1071 = vmatpush.msra.mxu3 %v2650_v11  ;;  %1383 = vmatpush.msra.mxu1 %v2650_v11 }
 0xbfc   :  { %v862_v27 = vadd.f32 %v861_v62, %v3046_v5 }
 0xbfd   :  { %1072 = vmatpush.msra.mxu3 %v2659_v19  ;;  %1384 = vmatpush.msra.mxu1 %v2659_v19 }
 0xbfe   :  { %1856 = vtanh.f32 %v862_v27 }
 0xbff   :  { %1073 = vmatpush.msra.mxu3 %v2670_v50  ;;  %1385 = vmatpush.msra.mxu1 %v2670_v50 }
 0xc01   :  { %1074 = vmatpush.msra.mxu3 %v2677_v21  ;;  %1386 = vmatpush.msra.mxu1 %v2677_v21 }
 0xc03   :  { %1075 = vmatpush.msra.mxu3 %v2686_v49  ;;  %1387 = vmatpush.msra.mxu1 %v2686_v49 }
 0xc04   :  { %v1857_v40 = vpop.eup %1856  ;;  %1076 = vmatmul.f32.vlgmr.msra.gmra.mxu3 %v3047_v44 }
 0xc05   :  { %866 = vrot.lane.b32.xlu1 %v1857_v40, %s1934_s3  ;;  %1146 = vmatpush.msrb.mxu3 %v2629_v45 }
 0xc07   :  { %1147 = vmatpush.msrb.mxu3 %v2634_v46 }
 0xc09   :  { %1148 = vmatpush.msrb.mxu3 %v2641_v48 }
 0xc0b   :  { %1149 = vmatpush.msrb.mxu3 %v2650_v11 }
 0xc0d   :  { %1150 = vmatpush.msrb.mxu3 %v2659_v19 }
 0xc0f   :  { %1151 = vmatpush.msrb.mxu3 %v2670_v50 }
 0xc11   :  { %1152 = vmatpush.msrb.mxu3 %v2677_v21 }
 0xc13   :  { %1153 = vmatpush.msrb.mxu3 %v2686_v49 }
 0xc15   :  { %1224 = vmatpush.msra.mxu3 %v2629_v45 }
 0xc17   :  { %1225 = vmatpush.msra.mxu3 %v2634_v46 }
 0xc19   :  { %1226 = vmatpush.msra.mxu3 %v2641_v48 }
 0xc1b   :  { %1227 = vmatpush.msra.mxu3 %v2650_v11 }
 0xc1d   :  { %1228 = vmatpush.msra.mxu3 %v2659_v19 }
 0xc1f   :  { %1229 = vmatpush.msra.mxu3 %v2670_v50 }
 0xc21   :  { %1230 = vmatpush.msra.mxu3 %v2677_v21 }
 0xc23   :  { %1231 = vmatpush.msra.mxu3 %v2686_v49 }
 0xc77   :  { %v867_v63 = vpop.permute.xlu1 %866 }
 0xc78   :  { %v869_v3 = vmul.f32 %v867_v63, %v864_v0 }
 0xc7a   :  { %v871_v6 = vadd.f32 %v870_v16, %v869_v3 }
 0xc7c   :  { %873 = vrot.lane.b32.xlu2 %v871_v6, %s1934_s3 }
 0xcd6   :  { %v874_v32 = vpop.permute.xlu2 %873 }
 0xcd7   :  { %876 = vst.msk [vmem:[#allocation2 + $0x38] sm:$0xff] %vm307_vm0, %v874_v32 }
 0xcd8   :  { %877 = vst.msk [vmem:[#allocation2] sm:$0xff] %vm309_vm1, %v874_v32 }
 0xcde   :  { %v885_v22 = vld [vmem:[#allocation2 + $0x38] sm:$0xff] }
 0xcdf   :  { %v878_v33 = vld [vmem:[#allocation2] sm:$0xff] }
 0xce0   :  { %1762 = vmatmul.msk.f32.vlgmr.msrb.gmra.mxu0 %vm228_vm15, %v878_v33  ;;  %1770 = vmatmul.msk.f32.vlgmr.msrb.gmra.mxu1 %vm228_vm15, %v878_v33  ;;  %v1778_v33 = vld [vmem:[%s3037_s1 + $0x220] ss:$8 sm:$0x3] }
 0xce1   :  { %1516 = vmatpush.msrb.mxu0 %v2562_v10  ;;  %1536 = vmatpush.msrb.mxu1 %v2629_v45 }
 0xce3   :  { %1517 = vmatpush.msrb.mxu0 %v2567_v18  ;;  %1537 = vmatpush.msrb.mxu1 %v2634_v46 }
 0xce5   :  { %1518 = vmatpush.msrb.mxu0 %v2576_v35  ;;  %1538 = vmatpush.msrb.mxu1 %v2641_v48 }
 0xce7   :  { %1519 = vmatpush.msrb.mxu0 %v2583_v1  ;;  %1539 = vmatpush.msrb.mxu1 %v2650_v11 }
 0xce8   :  { %1763 = vmatmul.msk.f32.gmra.mxu0 %vm228_vm15, %v879_v23  ;;  %1771 = vmatmul.msk.f32.gmra.mxu1 %vm228_vm15, %v879_v23 }
 0xce9   :  { %1520 = vmatpush.msrb.mxu0 %v2590_v47  ;;  %1540 = vmatpush.msrb.mxu1 %v2659_v19 }
 0xceb   :  { %1521 = vmatpush.msrb.mxu0 %v2597_v57  ;;  %1541 = vmatpush.msrb.mxu1 %v2670_v50 }
 0xced   :  { %1522 = vmatpush.msrb.mxu0 %v2605_v38  ;;  %1542 = vmatpush.msrb.mxu1 %v2677_v21 }
 0xcef   :  { %1523 = vmatpush.msrb.mxu0 %v2613_v43  ;;  %1543 = vmatpush.msrb.mxu1 %v2686_v49 }
 0xcf0   :  { %1764 = vmatmul.msk.f32.gmra.mxu0 %vm228_vm15, %v880_v36  ;;  %1772 = vmatmul.msk.f32.gmra.mxu1 %vm228_vm15, %v880_v36 }
 0xcf8   :  { %1765 = vmatmul.msk.f32.gmra.mxu0 %vm228_vm15, %v881_v39  ;;  %1773 = vmatmul.msk.f32.gmra.mxu1 %vm228_vm15, %v881_v39 }
 0xd00   :  { %1766 = vmatmul.msk.f32.gmra.mxu0 %vm228_vm15, %v882_v2  ;;  %1774 = vmatmul.msk.f32.gmra.mxu1 %vm228_vm15, %v882_v2  ;;  %v2813_v2 = vperm.slane %v1778_v33, 0 }
 0xd08   :  { %1767 = vmatmul.msk.f32.gmra.mxu0 %vm228_vm15, %v883_v51  ;;  %1775 = vmatmul.msk.f32.gmra.mxu1 %vm228_vm15, %v883_v51  ;;  %v1057_v51 = vpop.f32.mrf.mxu2 }
 0xd09   :  { %v1058_v24 = vadd.f32 %v1057_v51, %v2813_v2 }
 0xd10   :  { %1768 = vmatmul.msk.f32.gmra.mxu0 %vm228_vm15, %v884_v52  ;;  %1776 = vmatmul.msk.f32.gmra.mxu1 %vm228_vm15, %v884_v52 }
 0xd18   :  { %1769 = vmatmul.msk.f32.gmra.mxu0 %vm228_vm15, %v885_v22  ;;  %1777 = vmatmul.msk.f32.gmra.mxu1 %vm228_vm15, %v885_v22 }
 0xd5d   :  { %v950_v31 = vpop.f32.mrf.mxu0  ;;  %v991_v42 = vpop.f32.mrf.mxu1 }
 0xd65   :  { %v953_v53 = vpop.f32.mrf.mxu0  ;;  %v994_v60 = vpop.f32.mrf.mxu1 }
 0xd66   :  { %v2738_v59 = vadd.f32 %v953_v53, %v905_v4  ;;  %v2740_v7 = vadd.f32 %v994_v60, %v906_v14  ;;  %v2816_v53 = vadd.f32 %v950_v31, %v905_v4  ;;  %v2818_v60 = vadd.f32 %v991_v42, %v906_v14 }
 0xd6d   :  { %v956_v9 = vpop.f32.mrf.mxu0  ;;  %v997_v58 = vpop.f32.mrf.mxu1 }
 0xd6e   :  { %v2742_v62 = vadd.f32 %v956_v9, %v905_v4  ;;  %v2744_v5 = vadd.f32 %v997_v58, %v906_v14 }
 0xd75   :  { %v959_v27 = vpop.f32.mrf.mxu0  ;;  %v1000_v40 = vpop.f32.mrf.mxu1 }
 0xd76   :  { %v2746_v25 = vadd.f32 %v959_v27, %v905_v4  ;;  %v2748_v41 = vadd.f32 %v1000_v40, %v906_v14 }
 0xd7d   :  { %v962_v37 = vpop.f32.mrf.mxu0  ;;  %v1003_v8 = vpop.f32.mrf.mxu1 }
 0xd7e   :  { %v2750_v12 = vadd.f32 %v962_v37, %v905_v4  ;;  %v2752_v20 = vadd.f32 %v1003_v8, %v906_v14 }
 0xd80   :  { %v1268_v61 = vsel %vm2230_vm9, %v2748_v41, %v2752_v20  ;;  %v1346_v54 = vsel %vm2230_vm9, %v2752_v20, %v2748_v41  ;;  %v1267_v0 = vsel %vm2234_vm10, %v2746_v25, %v2750_v12  ;;  %v1345_v63 = vsel %vm2234_vm10, %v2750_v12, %v2746_v25 }
 0xd85   :  { %v965_v16 = vpop.f32.mrf.mxu0  ;;  %v1006_v3 = vpop.f32.mrf.mxu1 }
 0xd86   :  { %v2770_v6 = vadd.f32 %v965_v16, %v905_v4  ;;  %v2772_v30 = vadd.f32 %v1006_v3, %v906_v14  ;;  %v2836_v3 = vperm.slane %v1778_v33, 1 }
 0xd88   :  { %v1190_v34 = vsel %vm2230_vm9, %v2744_v5, %v2772_v30  ;;  %v1424_v26 = vsel %vm2230_vm9, %v2772_v30, %v2744_v5  ;;  %v1189_v56 = vsel %vm2234_vm10, %v2742_v62, %v2770_v6  ;;  %v1423_v13 = vsel %vm2234_vm10, %v2770_v6, %v2742_v62 }
 0xd8d   :  { %v968_v55 = vpop.f32.mrf.mxu0  ;;  %v1009_v28 = vpop.f32.mrf.mxu1 }
 0xd8e   :  { %v2790_v29 = vadd.f32 %v968_v55, %v905_v4  ;;  %v2792_v32 = vadd.f32 %v1009_v28, %v906_v14  ;;  %v1077_v28 = vpop.f32.mrf.mxu3 }
 0xd8f   :  { %v1078_v27 = vadd.f32 %v1077_v28, %v2836_v3 }
 0xd90   :  { %v1112_v23 = vsel %vm2230_vm9, %v2740_v7, %v2792_v32  ;;  %v1111_v44 = vsel %vm2234_vm10, %v2738_v59, %v2790_v29  ;;  %v1501_v39 = vsel %vm2234_vm10, %v2790_v29, %v2738_v59 }
 0xd95   :  { %v971_v52 = vpop.f32.mrf.mxu0  ;;  %v1012_v22 = vpop.f32.mrf.mxu1 }
 0xd96   :  { %v2820_v9 = vadd.f32 %v971_v52, %v905_v4  ;;  %v2822_v58 = vadd.f32 %v1012_v22, %v906_v14 }
 0xd98   :  { %v1033_v40 = vsel %vm2234_vm10, %v2816_v53, %v2820_v9  ;;  %v1034_v33 = vsel %vm2230_vm9, %v2818_v60, %v2822_v58 }
 0xd99   :  { %v1080_v42 = vadd.f32 %v1058_v24, %v1033_v40 }
 0xd9b   :  { %v1779_v4 = vmul.f32 -1.442695, %v1080_v42 }
 0xd9d   :  { %1858 = vpow2.f32 %v1779_v4 }
 0xda3   :  { %v1859_v14 = vpop.eup %1858 }
 0xda4   :  { %v1084_v37 = vadd.f32 1.0, %v1859_v14 }
 0xda6   :  { %1860 = vrcp.f32 %v1084_v37  ;;  %v1096_v51 = vand.u32 2147483648, %v1084_v37  ;;  %v1094_v22 = vand.u32 2147483647, %v1084_v37  ;;  %vm1090_vm1 = vweird.f32 %v1084_v37 }
 0xda8   :  { %v1097_v24 = vor.u32 1.1754944e-38, %v1096_v51  ;;  %vm1095_vm11 = vcmp.eq.f32.partialorder %v1094_v22, 8.507059e+37 }
 0xdac   :  { %v1861_v8 = vpop.eup %1860 }
 0xdad   :  { %v1086_v16 = vmul.f32 %v1861_v8, %v1084_v37  ;;  %vm1091_vm0 = vweird.f32 %v1861_v8 }
 0xdae   :  { %vm1092_vm8 = vmor %vm1090_vm1, %vm1091_vm0 }
 0xdaf   :  { %v1087_v55 = vsub.f32 1.0, %v1086_v16 }
 0xdb1   :  { %v1088_v52 = vmul.f32 %v1861_v8, %v1087_v55 }
 0xdb3   :  { %v1089_v36 = vadd.f32 %v1861_v8, %v1088_v52 }
 0xdb5   :  { %v1093_v40 = vsel %vm1092_vm8, %v1861_v8, %v1089_v36 }
 0xdb6   :  { %v1098_v42 = vsel %vm1095_vm11, %v1097_v24, %v1093_v40 }
 0xdb7   :  { %v1100_v4 = vmul.f32 %v1098_v42, %v1078_v27  ;;  %v1103_v55 = vsub.f32 1.0, %v1098_v42  ;;  %v1109_v52 = vmul.f32 0.0, %v1098_v42 }
 0xdb9   :  { %v1101_v14 = vadd.f32 %v1100_v4, %v1034_v33 }
 0xdbb   :  { %1862 = vtanh.f32 %v1101_v14 }
 0xdc1   :  { %v1863_v16 = vpop.eup %1862 }
 0xdc2   :  { %1105 = vrot.lane.b32.xlu0 %v1863_v16, %s1934_s3 }
 0xe34   :  { %v1106_v28 = vpop.permute.xlu0 %1105 }
 0xe35   :  { %v1108_v37 = vmul.f32 %v1106_v28, %v1103_v55 }
 0xe37   :  { %v1110_v31 = vadd.f32 %v1109_v52, %v1108_v37 }
 0xe39   :  { %1114 = vrot.lane.b32.xlu1 %v1110_v31, %s1934_s3 }
 0xeab   :  { %v1115_v36 = vpop.permute.xlu1 %1114 }
 0xeac   :  { %1780 = vmatmul.msk.f32.vlgmr.msrb.gmra.mxu2 %vm228_vm15, %v1115_v36  ;;  %1781 = vmatmul.msk.f32.vlgmr.msrb.gmra.mxu3 %vm228_vm15, %v1115_v36 }
 0xead   :  { %1282 = vmatpush.msrb.mxu2 %v2562_v10  ;;  %1302 = vmatpush.msrb.mxu3 %v2629_v45 }
 0xeaf   :  { %1283 = vmatpush.msrb.mxu2 %v2567_v18  ;;  %1303 = vmatpush.msrb.mxu3 %v2634_v46 }
 0xeb1   :  { %1284 = vmatpush.msrb.mxu2 %v2576_v35  ;;  %1304 = vmatpush.msrb.mxu3 %v2641_v48 }
 0xeb3   :  { %1285 = vmatpush.msrb.mxu2 %v2583_v1  ;;  %1305 = vmatpush.msrb.mxu3 %v2650_v11 }
 0xeb5   :  { %1286 = vmatpush.msrb.mxu2 %v2590_v47  ;;  %1306 = vmatpush.msrb.mxu3 %v2659_v19 }
 0xeb7   :  { %1287 = vmatpush.msrb.mxu2 %v2597_v57  ;;  %1307 = vmatpush.msrb.mxu3 %v2670_v50 }
 0xeb9   :  { %1288 = vmatpush.msrb.mxu2 %v2605_v38  ;;  %1308 = vmatpush.msrb.mxu3 %v2677_v21 }
 0xebb   :  { %1289 = vmatpush.msrb.mxu2 %v2613_v43  ;;  %1309 = vmatpush.msrb.mxu3 %v2686_v49 }
 0xf2f   :  { %v1135_v27 = vpop.f32.mrf.mxu2  ;;  %v1155_v28 = vpop.f32.mrf.mxu3 }
 0xf30   :  { %v1136_v8 = vadd.f32 %v1135_v27, %v2813_v2  ;;  %v1156_v36 = vadd.f32 %v1155_v28, %v2836_v3 }
 0xf32   :  { %v1158_v51 = vadd.f32 %v1136_v8, %v1111_v44 }
 0xf34   :  { %v1782_v22 = vmul.f32 -1.442695, %v1158_v51 }
 0xf36   :  { %1864 = vpow2.f32 %v1782_v22 }
 0xf3c   :  { %v1865_v24 = vpop.eup %1864 }
 0xf3d   :  { %v1162_v40 = vadd.f32 1.0, %v1865_v24 }
 0xf3f   :  { %1866 = vrcp.f32 %v1162_v40  ;;  %v1174_v14 = vand.u32 2147483648, %v1162_v40  ;;  %v1172_v55 = vand.u32 2147483647, %v1162_v40  ;;  %vm1168_vm13 = vweird.f32 %v1162_v40 }
 0xf41   :  { %v1175_v37 = vor.u32 1.1754944e-38, %v1174_v14  ;;  %vm1173_vm2 = vcmp.eq.f32.partialorder %v1172_v55, 8.507059e+37 }
 0xf45   :  { %v1867_v42 = vpop.eup %1866 }
 0xf46   :  { %v1164_v4 = vmul.f32 %v1867_v42, %v1162_v40  ;;  %vm1169_vm12 = vweird.f32 %v1867_v42 }
 0xf47   :  { %vm1170_vm14 = vmor %vm1168_vm13, %vm1169_vm12 }
 0xf48   :  { %v1165_v33 = vsub.f32 1.0, %v1164_v4 }
 0xf4a   :  { %v1166_v16 = vmul.f32 %v1867_v42, %v1165_v33 }
 0xf4c   :  { %v1167_v52 = vadd.f32 %v1867_v42, %v1166_v16 }
 0xf4e   :  { %v1171_v44 = vsel %vm1170_vm14, %v1867_v42, %v1167_v52 }
 0xf4f   :  { %v1176_v27 = vsel %vm1173_vm2, %v1175_v37, %v1171_v44 }
 0xf50   :  { %v1178_v8 = vmul.f32 %v1176_v27, %v1156_v36  ;;  %v1181_v24 = vsub.f32 1.0, %v1176_v27  ;;  %v1187_v4 = vmul.f32 %v1176_v27, %v1110_v31 }
 0xf52   :  { %v1179_v51 = vadd.f32 %v1178_v8, %v1112_v23 }
 0xf54   :  { %1868 = vtanh.f32 %v1179_v51 }
 0xf5a   :  { %v1869_v22 = vpop.eup %1868 }
 0xf5b   :  { %1183 = vrot.lane.b32.xlu2 %v1869_v22, %s1934_s3 }
 0xfb5   :  { %v1184_v40 = vpop.permute.xlu2 %1183 }
 0xfb6   :  { %v1186_v33 = vmul.f32 %v1184_v40, %v1181_v24 }
 0xfb8   :  { %v1188_v14 = vadd.f32 %v1187_v4, %v1186_v33 }
 0xfba   :  { %1192 = vrot.lane.b32.xlu0 %v1188_v14, %s1934_s3 }
0x102c   :  { %v1193_v42 = vpop.permute.xlu0 %1192 }
0x102d   :  { %1783 = vmatmul.msk.f32.vlgmr.msra.gmra.mxu2 %vm228_vm15, %v1193_v42  ;;  %1784 = vmatmul.msk.f32.vlgmr.msra.gmra.mxu3 %vm228_vm15, %v1193_v42 }
0x102e   :  { %1438 = vmatpush.msra.mxu2 %v2562_v10  ;;  %1458 = vmatpush.msra.mxu3 %v2629_v45 }
0x1030   :  { %1439 = vmatpush.msra.mxu2 %v2567_v18  ;;  %1459 = vmatpush.msra.mxu3 %v2634_v46 }
0x1032   :  { %1440 = vmatpush.msra.mxu2 %v2576_v35  ;;  %1460 = vmatpush.msra.mxu3 %v2641_v48 }
0x1034   :  { %1441 = vmatpush.msra.mxu2 %v2583_v1  ;;  %1461 = vmatpush.msra.mxu3 %v2650_v11 }
0x1036   :  { %1442 = vmatpush.msra.mxu2 %v2590_v47  ;;  %1462 = vmatpush.msra.mxu3 %v2659_v19 }
0x1038   :  { %1443 = vmatpush.msra.mxu2 %v2597_v57  ;;  %1463 = vmatpush.msra.mxu3 %v2670_v50 }
0x103a   :  { %1444 = vmatpush.msra.mxu2 %v2605_v38  ;;  %1464 = vmatpush.msra.mxu3 %v2677_v21 }
0x103c   :  { %1445 = vmatpush.msra.mxu2 %v2613_v43  ;;  %1465 = vmatpush.msra.mxu3 %v2686_v49 }
0x10b0   :  { %v1213_v23 = vpop.f32.mrf.mxu2  ;;  %v1233_v22 = vpop.f32.mrf.mxu3 }
0x10b1   :  { %v1214_v31 = vadd.f32 %v1213_v23, %v2813_v2  ;;  %v1234_v4 = vadd.f32 %v1233_v22, %v2836_v3 }
0x10b3   :  { %v1236_v16 = vadd.f32 %v1214_v31, %v1189_v56 }
0x10b5   :  { %v1785_v55 = vmul.f32 -1.442695, %v1236_v16 }
0x10b7   :  { %1870 = vpow2.f32 %v1785_v55 }
0x10bd   :  { %v1871_v28 = vpop.eup %1870 }
0x10be   :  { %v1240_v52 = vadd.f32 1.0, %v1871_v28 }
0x10c0   :  { %1872 = vrcp.f32 %v1240_v52  ;;  %v1252_v27 = vand.u32 2147483648, %v1240_v52  ;;  %v1250_v51 = vand.u32 2147483647, %v1240_v52  ;;  %vm1246_vm4 = vweird.f32 %v1240_v52 }
0x10c2   :  { %v1253_v40 = vor.u32 1.1754944e-38, %v1252_v27  ;;  %vm1251_vm6 = vcmp.eq.f32.partialorder %v1250_v51, 8.507059e+37 }
0x10c6   :  { %v1873_v37 = vpop.eup %1872 }
0x10c7   :  { %v1242_v36 = vmul.f32 %v1873_v37, %v1240_v52  ;;  %vm1247_vm3 = vweird.f32 %v1873_v37 }
0x10c8   :  { %vm1248_vm5 = vmor %vm1246_vm4, %vm1247_vm3 }
0x10c9   :  { %v1243_v44 = vsub.f32 1.0, %v1242_v36 }
0x10cb   :  { %v1244_v8 = vmul.f32 %v1873_v37, %v1243_v44 }
0x10cd   :  { %v1245_v24 = vadd.f32 %v1873_v37, %v1244_v8 }
0x10cf   :  { %v1249_v56 = vsel %vm1248_vm5, %v1873_v37, %v1245_v24 }
0x10d0   :  { %v1254_v33 = vsel %vm1251_vm6, %v1253_v40, %v1249_v56 }
0x10d1   :  { %v1256_v42 = vmul.f32 %v1254_v33, %v1234_v4  ;;  %v1259_v16 = vsub.f32 1.0, %v1254_v33  ;;  %v1265_v28 = vmul.f32 %v1254_v33, %v1188_v14 }
0x10d3   :  { %v1257_v23 = vadd.f32 %v1256_v42, %v1190_v34 }
0x10d5   :  { %1874 = vtanh.f32 %v1257_v23 }
0x10db   :  { %v1875_v31 = vpop.eup %1874 }
0x10dc   :  { %1261 = vrot.lane.b32.xlu1 %v1875_v31, %s1934_s3 }
0x114e   :  { %v1262_v55 = vpop.permute.xlu1 %1261 }
0x114f   :  { %v1264_v52 = vmul.f32 %v1262_v55, %v1259_v16 }
0x1151   :  { %v1266_v36 = vadd.f32 %v1265_v28, %v1264_v52 }
0x1153   :  { %1270 = vrot.lane.b32.xlu2 %v1266_v36, %s1934_s3 }
0x11ad   :  { %v1271_v37 = vpop.permute.xlu2 %1270 }
0x11ae   :  { %1786 = vmatmul.msk.f32.vlgmr.msrb.gmra.mxu2 %vm228_vm15, %v1271_v37  ;;  %1787 = vmatmul.msk.f32.vlgmr.msrb.gmra.mxu3 %vm228_vm15, %v1271_v37 }
0x11af   :  { %1594 = vmatpush.msrb.mxu2 %v2562_v10  ;;  %1614 = vmatpush.msrb.mxu3 %v2629_v45 }
0x11b1   :  { %1595 = vmatpush.msrb.mxu2 %v2567_v18  ;;  %1615 = vmatpush.msrb.mxu3 %v2634_v46 }
0x11b3   :  { %1596 = vmatpush.msrb.mxu2 %v2576_v35  ;;  %1616 = vmatpush.msrb.mxu3 %v2641_v48 }
0x11b5   :  { %1597 = vmatpush.msrb.mxu2 %v2583_v1  ;;  %1617 = vmatpush.msrb.mxu3 %v2650_v11 }
0x11b7   :  { %1598 = vmatpush.msrb.mxu2 %v2590_v47  ;;  %1618 = vmatpush.msrb.mxu3 %v2659_v19 }
0x11b9   :  { %1599 = vmatpush.msrb.mxu2 %v2597_v57  ;;  %1619 = vmatpush.msrb.mxu3 %v2670_v50 }
0x11bb   :  { %1600 = vmatpush.msrb.mxu2 %v2605_v38  ;;  %1620 = vmatpush.msrb.mxu3 %v2677_v21 }
0x11bd   :  { %1601 = vmatpush.msrb.mxu2 %v2613_v43  ;;  %1621 = vmatpush.msrb.mxu3 %v2686_v49 }
0x1231   :  { %v1291_v10 = vpop.f32.mrf.mxu2  ;;  %v1311_v19 = vpop.f32.mrf.mxu3 }
0x1232   :  { %v1292_v18 = vadd.f32 %v1291_v10, %v2813_v2  ;;  %v1312_v49 = vadd.f32 %v1311_v19, %v2836_v3 }
0x1234   :  { %v1314_v35 = vadd.f32 %v1292_v18, %v1267_v0 }
0x1236   :  { %v1788_v1 = vmul.f32 -1.442695, %v1314_v35 }
0x1238   :  { %1876 = vpow2.f32 %v1788_v1 }
0x123e   :  { %v1877_v47 = vpop.eup %1876 }
0x123f   :  { %v1318_v57 = vadd.f32 1.0, %v1877_v47 }
0x1241   :  { %1878 = vrcp.f32 %v1318_v57  ;;  %v1330_v43 = vand.u32 2147483648, %v1318_v57  ;;  %v1328_v11 = vand.u32 2147483647, %v1318_v57  ;;  %vm1324_vm0 = vweird.f32 %v1318_v57 }
0x1243   :  { %v1331_v21 = vor.u32 1.1754944e-38, %v1330_v43  ;;  %vm1329_vm8 = vcmp.eq.f32.partialorder %v1328_v11, 8.507059e+37 }
0x1247   :  { %v1879_v38 = vpop.eup %1878 }
0x1248   :  { %v1320_v45 = vmul.f32 %v1879_v38, %v1318_v57  ;;  %vm1325_vm7 = vweird.f32 %v1879_v38 }
0x1249   :  { %vm1326_vm1 = vmor %vm1324_vm0, %vm1325_vm7 }
0x124a   :  { %v1321_v46 = vsub.f32 1.0, %v1320_v45 }
0x124c   :  { %v1322_v48 = vmul.f32 %v1879_v38, %v1321_v46 }
0x124e   :  { %v1323_v50 = vadd.f32 %v1879_v38, %v1322_v48 }
0x1250   :  { %v1327_v0 = vsel %vm1326_vm1, %v1879_v38, %v1323_v50 }
0x1251   :  { %v1332_v34 = vsel %vm1329_vm8, %v1331_v21, %v1327_v0 }
0x1252   :  { %v1334_v14 = vmul.f32 %v1332_v34, %v1312_v49  ;;  %v1337_v8 = vsub.f32 1.0, %v1332_v34  ;;  %v1343_v22 = vmul.f32 %v1332_v34, %v1266_v36 }
0x1254   :  { %v1335_v44 = vadd.f32 %v1334_v14, %v1268_v61 }
0x1256   :  { %1880 = vtanh.f32 %v1335_v44 }
0x125c   :  { %v1881_v27 = vpop.eup %1880 }
0x125d   :  { %1339 = vrot.lane.b32.xlu0 %v1881_v27, %s1934_s3 }
0x12cf   :  { %v1340_v51 = vpop.permute.xlu0 %1339 }
0x12d0   :  { %v1342_v24 = vmul.f32 %v1340_v51, %v1337_v8 }
0x12d2   :  { %v1344_v40 = vadd.f32 %v1343_v22, %v1342_v24 }
0x12d4   :  { %1348 = vrot.lane.b32.xlu1 %v1344_v40, %s1934_s3 }
0x1346   :  { %v1349_v4 = vpop.permute.xlu1 %1348 }
0x1347   :  { %1789 = vmatmul.msk.f32.vlgmr.msra.gmra.mxu0 %vm228_vm15, %v1349_v4  ;;  %1790 = vmatmul.msk.f32.vlgmr.msra.gmra.mxu1 %vm228_vm15, %v1349_v4 }
0x13c4   :  { %v1369_v56 = vpop.f32.mrf.mxu0  ;;  %v1389_v10 = vpop.f32.mrf.mxu1 }
0x13c5   :  { %v1370_v33 = vadd.f32 %v1369_v56, %v2813_v2  ;;  %v1390_v25 = vadd.f32 %v1389_v10, %v2836_v3 }
0x13c7   :  { %v1392_v61 = vadd.f32 %v1370_v33, %v1345_v63 }
0x13c9   :  { %v1791_v42 = vmul.f32 -1.442695, %v1392_v61 }
0x13cb   :  { %1882 = vpow2.f32 %v1791_v42 }
0x13d1   :  { %v1883_v23 = vpop.eup %1882 }
0x13d2   :  { %v1396_v31 = vadd.f32 1.0, %v1883_v23 }
0x13d4   :  { %1884 = vrcp.f32 %v1396_v31  ;;  %v1408_v52 = vand.u32 2147483648, %v1396_v31  ;;  %v1406_v37 = vand.u32 2147483647, %v1396_v31  ;;  %vm1402_vm12 = vweird.f32 %v1396_v31 }
0x13d6   :  { %v1409_v35 = vor.u32 1.1754944e-38, %v1408_v52  ;;  %vm1407_vm14 = vcmp.eq.f32.partialorder %v1406_v37, 8.507059e+37 }
0x13da   :  { %v1885_v16 = vpop.eup %1884 }
0x13db   :  { %v1398_v55 = vmul.f32 %v1885_v16, %v1396_v31  ;;  %vm1403_vm11 = vweird.f32 %v1885_v16 }
0x13dc   :  { %vm1404_vm13 = vmor %vm1402_vm12, %vm1403_vm11 }
0x13dd   :  { %v1399_v28 = vsub.f32 1.0, %v1398_v55 }
0x13df   :  { %v1400_v36 = vmul.f32 %v1885_v16, %v1399_v28 }
0x13e1   :  { %v1401_v18 = vadd.f32 %v1885_v16, %v1400_v36 }
0x13e3   :  { %v1405_v12 = vsel %vm1404_vm13, %v1885_v16, %v1401_v18 }
0x13e4   :  { %v1410_v63 = vsel %vm1407_vm14, %v1409_v35, %v1405_v12 }
0x13e5   :  { %v1412_v1 = vmul.f32 %v1410_v63, %v1390_v25  ;;  %v1415_v38 = vsub.f32 1.0, %v1410_v63  ;;  %v1421_v46 = vmul.f32 %v1410_v63, %v1344_v40 }
0x13e7   :  { %v1413_v47 = vadd.f32 %v1412_v1, %v1346_v54 }
0x13e9   :  { %1886 = vtanh.f32 %v1413_v47  ;;  %v3048_v47 = vsel %vm2230_vm9, %v2792_v32, %v2740_v7  ;;  %v3049_v32 = vsel %vm2234_vm10, %v2820_v9, %v2816_v53 }
0x13ef   :  { %v1887_v57 = vpop.eup %1886 }
0x13f0   :  { %1417 = vrot.lane.b32.xlu2 %v1887_v57, %s1934_s3 }
0x144a   :  { %v1418_v45 = vpop.permute.xlu2 %1417 }
0x144b   :  { %v1420_v43 = vmul.f32 %v1418_v45, %v1415_v38 }
0x144d   :  { %v1422_v48 = vadd.f32 %v1421_v46, %v1420_v43 }
0x144f   :  { %1426 = vrot.lane.b32.xlu0 %v1422_v48, %s1934_s3 }
0x14c1   :  { %v1427_v11 = vpop.permute.xlu0 %1426 }
0x14c2   :  { %1792 = vmatmul.msk.f32.vlgmr.msra.gmra.mxu2 %vm228_vm15, %v1427_v11  ;;  %1793 = vmatmul.msk.f32.vlgmr.msra.gmra.mxu3 %vm228_vm15, %v1427_v11 }
0x1545   :  { %v1447_v19 = vpop.f32.mrf.mxu2  ;;  %v1467_v8 = vpop.f32.mrf.mxu3 }
0x1546   :  { %v1448_v41 = vadd.f32 %v1447_v19, %v2813_v2  ;;  %v1468_v62 = vadd.f32 %v1467_v8, %v2836_v3 }
0x1548   :  { %v1470_v20 = vadd.f32 %v1448_v41, %v1423_v13 }
0x154a   :  { %v1794_v54 = vmul.f32 -1.442695, %v1470_v20 }
0x154c   :  { %1888 = vpow2.f32 %v1794_v54 }
0x1552   :  { %v1889_v50 = vpop.eup %1888 }
0x1553   :  { %v1474_v21 = vadd.f32 1.0, %v1889_v50 }
0x1555   :  { %1890 = vrcp.f32 %v1474_v21  ;;  %v1486_v14 = vand.u32 2147483648, %v1474_v21  ;;  %v1484_v27 = vand.u32 2147483647, %v1474_v21  ;;  %vm1480_vm3 = vweird.f32 %v1474_v21 }
0x1557   :  { %v1487_v22 = vor.u32 1.1754944e-38, %v1486_v14  ;;  %vm1485_vm5 = vcmp.eq.f32.partialorder %v1484_v27, 8.507059e+37 }
0x155b   :  { %v1891_v49 = vpop.eup %1890 }
0x155c   :  { %v1476_v0 = vmul.f32 %v1891_v49, %v1474_v21  ;;  %vm1481_vm2 = vweird.f32 %v1891_v49 }
0x155d   :  { %vm1482_vm4 = vmor %vm1480_vm3, %vm1481_vm2 }
0x155e   :  { %v1477_v34 = vsub.f32 1.0, %v1476_v0 }
0x1560   :  { %v1478_v44 = vmul.f32 %v1891_v49, %v1477_v34 }
0x1562   :  { %v1479_v51 = vadd.f32 %v1891_v49, %v1478_v44 }
0x1564   :  { %v1483_v6 = vsel %vm1482_vm4, %v1891_v49, %v1479_v51 }
0x1565   :  { %v1488_v13 = vsel %vm1485_vm5, %v1487_v22, %v1483_v6 }
0x1566   :  { %v1490_v24 = vmul.f32 %v1488_v13, %v1468_v62  ;;  %v1493_v56 = vsub.f32 1.0, %v1488_v13  ;;  %v1499_v61 = vmul.f32 %v1488_v13, %v1422_v48  ;;  %v3050_v62 = vsel %vm2230_vm9, %v2822_v58, %v2818_v60  ;;  %v1661_v60 = vld [vmem:[%s3037_s1 + $0x270] sm:$0xff]  ;;  %v1660_v58 = vld [vmem:[%s3037_s1 + $0x260] sm:$0xff] }
0x1567   :  { %vm1695_vm9 = vcmask 76800  }
0x1568   :  { %v1491_v40 = vadd.f32 %v1490_v24, %v1424_v26  ;;  %v1664_v24 = vld [vmem:[%s3037_s1 + $0x2a0] sm:$0xff] }
0x1569   :  { %1683 = vmatpush.msra.mxu0 %v1664_v24 }
0x156a   :  { %1892 = vtanh.f32 %v1491_v40  ;;  %v1659_v40 = vld [vmem:[%s3037_s1 + $0x250] sm:$0xff] }
0x1570   :  { %v1893_v4 = vpop.eup %1892 }
0x1571   :  { %1495 = vrot.lane.b32.xlu1 %v1893_v4, %s1934_s3  ;;  %v1658_v4 = vld [vmem:[%s3037_s1 + $0x240] sm:$0xff] }
0x15e3   :  { %v1496_v33 = vpop.permute.xlu1 %1495 }
0x15e4   :  { %v1498_v42 = vmul.f32 %v1496_v33, %v1493_v56  ;;  %v1657_v56 = vld [vmem:[%s3037_s1 + $0x230] sm:$0xff] }
0x15e6   :  { %v1500_v23 = vadd.f32 %v1499_v61, %v1498_v42 }
0x15e8   :  { %1504 = vrot.lane.b32.xlu2 %v1500_v23, %s1934_s3 }
0x1642   :  { %v1505_v31 = vpop.permute.xlu2 %1504 }
0x1643   :  { %1795 = vmatmul.msk.f32.vlgmr.msrb.gmra.mxu0 %vm228_vm15, %v1505_v31  ;;  %1796 = vmatmul.msk.f32.vlgmr.msrb.gmra.mxu1 %vm228_vm15, %v1505_v31 }
0x16c0   :  { %v1525_v16 = vpop.f32.mrf.mxu0  ;;  %v1545_v25 = vpop.f32.mrf.mxu1 }
0x16c1   :  { %v1526_v5 = vadd.f32 %v1525_v16, %v2813_v2  ;;  %v1546_v59 = vadd.f32 %v1545_v25, %v2836_v3 }
0x16c3   :  { %v1548_v30 = vadd.f32 %v1526_v5, %v1501_v39  ;;  %v1801_v5 = vld [vmem:[%s3037_s1 + $0x2b0] ss:$8 sm:$0x3] }
0x16c5   :  { %v1797_v26 = vmul.f32 -1.442695, %v1548_v30  ;;  %v1668_v30 = vperm.slane %v1801_v5, 0 }
0x16c7   :  { %1894 = vpow2.f32 %v1797_v26 }
0x16cd   :  { %v1895_v55 = vpop.eup %1894 }
0x16ce   :  { %v1552_v28 = vadd.f32 1.0, %v1895_v55 }
0x16d0   :  { %1896 = vrcp.f32 %v1552_v28  ;;  %v1564_v10 = vand.u32 2147483648, %v1552_v28  ;;  %v1562_v35 = vand.u32 2147483647, %v1552_v28  ;;  %vm1558_vm7 = vweird.f32 %v1552_v28 }
0x16d2   :  { %v1565_v63 = vor.u32 1.1754944e-38, %v1564_v10  ;;  %vm1563_vm1 = vcmp.eq.f32.partialorder %v1562_v35, 8.507059e+37 }
0x16d6   :  { %v1897_v52 = vpop.eup %1896 }
0x16d7   :  { %v1554_v36 = vmul.f32 %v1897_v52, %v1552_v28  ;;  %vm1559_vm6 = vweird.f32 %v1897_v52 }
0x16d8   :  { %vm1560_vm0 = vmor %vm1558_vm7, %vm1559_vm6 }
0x16d9   :  { %v1555_v37 = vsub.f32 1.0, %v1554_v36 }
0x16db   :  { %v1556_v18 = vmul.f32 %v1897_v52, %v1555_v37 }
0x16dd   :  { %v1557_v12 = vadd.f32 %v1897_v52, %v1556_v18 }
0x16df   :  { %v1561_v29 = vsel %vm1560_vm0, %v1897_v52, %v1557_v12 }
0x16e0   :  { %v1566_v39 = vsel %vm1563_vm1, %v1565_v63, %v1561_v29 }
0x16e1   :  { %v1568_v1 = vmul.f32 %v1566_v39, %v1546_v59  ;;  %v1571_v45 = vsub.f32 1.0, %v1566_v39  ;;  %v1577_v43 = vmul.f32 %v1566_v39, %v1500_v23 }
0x16e3   :  { %v1569_v57 = vadd.f32 %v1568_v1, %v3048_v47 }
0x16e5   :  { %1898 = vtanh.f32 %v1569_v57 }
0x16eb   :  { %v1899_v38 = vpop.eup %1898 }
0x16ec   :  { %1573 = vrot.lane.b32.xlu0 %v1899_v38, %s1934_s3 }
0x175e   :  { %v1574_v46 = vpop.permute.xlu0 %1573 }
0x175f   :  { %v1576_v48 = vmul.f32 %v1574_v46, %v1571_v45 }
0x1761   :  { %v1578_v11 = vadd.f32 %v1577_v43, %v1576_v48 }
0x1763   :  { %1582 = vrot.lane.b32.xlu1 %v1578_v11, %s1934_s3 }
0x17d5   :  { %v1583_v19 = vpop.permute.xlu1 %1582 }
0x17d6   :  { %1798 = vmatmul.msk.f32.vlgmr.msrb.gmra.mxu2 %vm228_vm15, %v1583_v19  ;;  %1799 = vmatmul.msk.f32.vlgmr.msrb.gmra.mxu3 %vm228_vm15, %v1583_v19 }
0x1859   :  { %v1603_v41 = vpop.f32.mrf.mxu2  ;;  %v1623_v8 = vpop.f32.mrf.mxu3 }
0x185a   :  { %v1604_v7 = vadd.f32 %v1603_v41, %v2813_v2  ;;  %v1624_v53 = vadd.f32 %v1623_v8, %v2836_v3  ;;  %v1663_v3 = vld [vmem:[%s3037_s1 + $0x290] sm:$0xff] }
0x185b   :  { %1684 = vmatpush.msra.mxu0 %v1663_v3 }
0x185c   :  { %v1626_v20 = vadd.f32 %v1604_v7, %v3049_v32 }
0x185d   :  { %1685 = vmatpush.msra.mxu0 %v1662_v15 }
0x185e   :  { %v1800_v54 = vmul.f32 -1.442695, %v1626_v20 }
0x185f   :  { %1686 = vmatpush.msra.mxu0 %v1661_v60 }
0x1860   :  { %1900 = vpow2.f32 %v1800_v54 }
0x1861   :  { %1687 = vmatpush.msra.mxu0 %v1660_v58 }
0x1863   :  { %1688 = vmatpush.msra.mxu0 %v1659_v40 }
0x1865   :  { %1689 = vmatpush.msra.mxu0 %v1658_v4 }
0x1866   :  { %v1901_v50 = vpop.eup %1900 }
0x1867   :  { %v1630_v21 = vadd.f32 1.0, %v1901_v50  ;;  %1690 = vmatpush.msra.mxu0 %v1657_v56 }
0x1869   :  { %1902 = vrcp.f32 %v1630_v21  ;;  %v1642_v14 = vand.u32 2147483648, %v1630_v21  ;;  %v1640_v27 = vand.u32 2147483647, %v1630_v21  ;;  %vm1636_vm11 = vweird.f32 %v1630_v21 }
0x186b   :  { %v1643_v17 = vor.u32 1.1754944e-38, %v1642_v14  ;;  %vm1641_vm10 = vcmp.eq.f32.partialorder %v1640_v27, 8.507059e+37 }
0x186f   :  { %v1903_v49 = vpop.eup %1902 }
0x1870   :  { %v1632_v0 = vmul.f32 %v1903_v49, %v1630_v21  ;;  %vm1637_vm8 = vweird.f32 %v1903_v49 }
0x1871   :  { %vm1638_vm12 = vmor %vm1636_vm11, %vm1637_vm8 }
0x1872   :  { %v1633_v34 = vsub.f32 1.0, %v1632_v0 }
0x1874   :  { %v1634_v44 = vmul.f32 %v1903_v49, %v1633_v34 }
0x1876   :  { %v1635_v2 = vadd.f32 %v1903_v49, %v1634_v44 }
0x1878   :  { %v1639_v9 = vsel %vm1638_vm12, %v1903_v49, %v1635_v2 }
0x1879   :  { %v1644_v51 = vsel %vm1641_vm10, %v1643_v17, %v1639_v9 }
0x187a   :  { %v1646_v22 = vmul.f32 %v1644_v51, %v1624_v53  ;;  %v1649_v33 = vsub.f32 1.0, %v1644_v51  ;;  %v1655_v42 = vmul.f32 %v1644_v51, %v1578_v11 }
0x187c   :  { %v1647_v6 = vadd.f32 %v1646_v22, %v3050_v62 }
0x187e   :  { %1904 = vtanh.f32 %v1647_v6 }
0x1884   :  { %v1905_v13 = vpop.eup %1904 }
0x1885   :  { %1651 = vrot.lane.b32.xlu2 %v1905_v13, %s1934_s3 }
0x18df   :  { %v1652_v61 = vpop.permute.xlu2 %1651 }
0x18e0   :  { %v1654_v23 = vmul.f32 %v1652_v61, %v1649_v33 }
0x18e2   :  { %v1656_v31 = vadd.f32 %v1655_v42, %v1654_v23 }
0x18e4   :  { %1671 = vrot.lane.b32.xlu0 %v1656_v31, %s1934_s3 }
0x1956   :  { %v1672_v16 = vpop.permute.xlu0 %1671 }
0x1957   :  { %1802 = vmatmul.msk.f32.vlgmr.msra.gmra.mxu0 %vm228_vm15, %v1672_v16 }
0x19d4   :  { %v1692_v26 = vpop.f32.mrf.mxu0 }
0x19d5   :  { %v1693_v55 = vadd.f32 %v1692_v26, %v1668_v30 }
0x19d7   :  { %1696 = vst.msk [vmem:[#allocation3] sm:$0xf] %vm1695_vm9, %v1693_v55 }
0x19d8   :  { %1707 = dma.vmem_to_hbm [thread:$0]  %s1703_s7, 64, %s1705_s10, [#allocation4]  }
0x19d9   :  { %1930 = dma.done.wait [#allocation4], 64  }
0x19da   :  { %1931 = vsyncadd [#allocation4], 4294967232 }
0x19db   :  { %1712 = vsyncpa [#allocation4], 1 }

</bundles_post_ra>
